<compile_context>
chip_gen: v7x
topology: tpu7x:2x2x1
jax: 0.10.0
libtpu: 0.0.40
codegen_flags: <defaults>
</compile_context>

<pallas_src>
import functools

import jax
import jax.numpy as jnp
from jax.experimental import pallas as pl
from jax.experimental.pallas import tpu as pltpu

EPS = 1e-5            # torch.nn.BatchNorm2d default
LANE = 128
_VMEM_LIMIT = 32 * 1024 * 1024


def _round_up(x, m):
    return (x + m - 1) // m * m


def _pick_tile(dim, candidates=(512, 256, 128)):
    for c in candidates:
        if dim >= c and dim % c == 0:
            return c
    return dim


# ----------------------------- kernels ---------------------------------------

def _bn_stats_kernel(x_ref, sum_ref, sq_ref):
    # Per-channel sum / sum-of-squares, accumulated across the M grid axis
    # into the (resident) output block.
    @pl.when(pl.program_id(0) == 0)
    def _():
        sum_ref[...] = jnp.zeros_like(sum_ref)
        sq_ref[...] = jnp.zeros_like(sq_ref)

    x = x_ref[...].astype(jnp.float32)
    sum_ref[...] += jnp.sum(x, axis=0, keepdims=True)
    sq_ref[...] += jnp.sum(x * x, axis=0, keepdims=True)


def _affine_relu_kernel(x_ref, s_ref, b_ref, o_ref):
    y = x_ref[...].astype(jnp.float32) * s_ref[...] + b_ref[...]
    o_ref[...] = jnp.maximum(y, 0.0).astype(o_ref.dtype)


def _matmul_kernel(a_ref, b_ref, o_ref, acc_ref):
    @pl.when(pl.program_id(2) == 0)
    def _():
        acc_ref[...] = jnp.zeros_like(acc_ref)

    acc_ref[...] += jnp.dot(a_ref[...], b_ref[...],
                            preferred_element_type=jnp.float32)

    @pl.when(pl.program_id(2) == pl.num_programs(2) - 1)
    def _():
        o_ref[...] = acc_ref[...].astype(o_ref.dtype)


def _matmul_add_kernel(a_ref, b_ref, r_ref, o_ref, acc_ref):
    @pl.when(pl.program_id(2) == 0)
    def _():
        acc_ref[...] = jnp.zeros_like(acc_ref)

    acc_ref[...] += jnp.dot(a_ref[...], b_ref[...],
                            preferred_element_type=jnp.float32)

    @pl.when(pl.program_id(2) == pl.num_programs(2) - 1)
    def _():
        # Residual is loaded/added only once per output tile.
        o_ref[...] = (acc_ref[...] + r_ref[...].astype(jnp.float32)
                      ).astype(o_ref.dtype)


def _matmul_stats_kernel(a_ref, b_ref, o_ref, sum_ref, sq_ref, acc_ref):
    # Matmul with fused per-column sum / sum-of-squares of the f32 result
    # (partial per M-tile; reduced over tiles outside, which is tiny).
    @pl.when(pl.program_id(2) == 0)
    def _():
        acc_ref[...] = jnp.zeros_like(acc_ref)

    acc_ref[...] += jnp.dot(a_ref[...], b_ref[...],
                            preferred_element_type=jnp.float32)

    @pl.when(pl.program_id(2) == pl.num_programs(2) - 1)
    def _():
        acc = acc_ref[...]
        o_ref[...] = acc.astype(o_ref.dtype)
        sum_ref[...] = jnp.sum(acc, axis=0, keepdims=True).reshape(sum_ref.shape)
        sq_ref[...] = jnp.sum(acc * acc, axis=0, keepdims=True).reshape(sq_ref.shape)


# ----------------------------- wrappers ---------------------------------------

def bn_stats(x2d, m_true):
    """x2d: (M_pad, Cp) f32, zero-padded rows beyond m_true. Returns mean, var."""
    M, C = x2d.shape
    tm = _pick_tile(M)
    s, sq = pl.pallas_call(
        _bn_stats_kernel,
        out_shape=(jax.ShapeDtypeStruct((1, C), jnp.float32),
                   jax.ShapeDtypeStruct((1, C), jnp.float32)),
        grid=(M // tm,),
        in_specs=[pl.BlockSpec((tm, C), lambda i: (i, 0))],
        out_specs=[pl.BlockSpec((1, C), lambda i: (0, 0)),
                   pl.BlockSpec((1, C), lambda i: (0, 0))],
        compiler_params=pltpu.CompilerParams(
            dimension_semantics=("arbitrary",),
            vmem_limit_bytes=_VMEM_LIMIT),
    )(x2d)
    mean = s / m_true
    var = jnp.maximum(sq / m_true - mean * mean, 0.0)
    return mean, var


def affine_relu(x2d, scale, shift, out_dtype=jnp.bfloat16):
    M, C = x2d.shape
    tm = _pick_tile(M)
    return pl.pallas_call(
        _affine_relu_kernel,
        out_shape=jax.ShapeDtypeStruct((M, C), out_dtype),
        grid=(M // tm,),
        in_specs=[pl.BlockSpec((tm, C), lambda i: (i, 0)),
                  pl.BlockSpec((1, C), lambda i: (0, 0)),
                  pl.BlockSpec((1, C), lambda i: (0, 0))],
        out_specs=pl.BlockSpec((tm, C), lambda i: (i, 0)),
        compiler_params=pltpu.CompilerParams(
            dimension_semantics=("parallel",),
            vmem_limit_bytes=_VMEM_LIMIT),
    )(x2d, scale, shift)


def _mm_tiles(M, N, K):
    return _pick_tile(M), _pick_tile(N), _pick_tile(K, (512, 384, 256, 128))


def matmul(a, b, out_dtype=jnp.float32):
    M, K = a.shape
    _, N = b.shape
    tm, tn, tk = _mm_tiles(M, N, K)
    return pl.pallas_call(
        _matmul_kernel,
        out_shape=jax.ShapeDtypeStruct((M, N), out_dtype),
        grid_spec=pltpu.PrefetchScalarGridSpec(
            num_scalar_prefetch=0,
            grid=(M // tm, N // tn, K // tk),
            in_specs=[pl.BlockSpec((tm, tk), lambda i, j, k: (i, k)),
                      pl.BlockSpec((tk, tn), lambda i, j, k: (k, j))],
            out_specs=pl.BlockSpec((tm, tn), lambda i, j, k: (i, j)),
            scratch_shapes=[pltpu.VMEM((tm, tn), jnp.float32)]),
        compiler_params=pltpu.CompilerParams(
            dimension_semantics=("parallel", "parallel", "arbitrary"),
            vmem_limit_bytes=_VMEM_LIMIT),
    )(a, b)


def matmul_add(a, b, r, out_dtype=jnp.float32):
    M, K = a.shape
    _, N = b.shape
    tm, tn, tk = _mm_tiles(M, N, K)
    return pl.pallas_call(
        _matmul_add_kernel,
        out_shape=jax.ShapeDtypeStruct((M, N), out_dtype),
        grid_spec=pltpu.PrefetchScalarGridSpec(
            num_scalar_prefetch=0,
            grid=(M // tm, N // tn, K // tk),
            in_specs=[pl.BlockSpec((tm, tk), lambda i, j, k: (i, k)),
                      pl.BlockSpec((tk, tn), lambda i, j, k: (k, j)),
                      pl.BlockSpec((tm, tn), lambda i, j, k: (i, j))],
            out_specs=pl.BlockSpec((tm, tn), lambda i, j, k: (i, j)),
            scratch_shapes=[pltpu.VMEM((tm, tn), jnp.float32)]),
        compiler_params=pltpu.CompilerParams(
            dimension_semantics=("parallel", "parallel", "arbitrary"),
            vmem_limit_bytes=_VMEM_LIMIT),
    )(a, b, r)


def matmul_stats(a, b, out_dtype=jnp.float32):
    """Matmul + fused per-column sum / sum-of-squares of the f32 result."""
    M, K = a.shape
    _, N = b.shape
    tm, tn, tk = _mm_tiles(M, N, K)
    gm = M // tm
    out, psum, psq = pl.pallas_call(
        _matmul_stats_kernel,
        out_shape=(jax.ShapeDtypeStruct((M, N), out_dtype),
                   jax.ShapeDtypeStruct((gm, 1, N), jnp.float32),
                   jax.ShapeDtypeStruct((gm, 1, N), jnp.float32)),
        grid_spec=pltpu.PrefetchScalarGridSpec(
            num_scalar_prefetch=0,
            grid=(gm, N // tn, K // tk),
            in_specs=[pl.BlockSpec((tm, tk), lambda i, j, k: (i, k)),
                      pl.BlockSpec((tk, tn), lambda i, j, k: (k, j))],
            out_specs=[pl.BlockSpec((tm, tn), lambda i, j, k: (i, j)),
                       pl.BlockSpec((1, 1, tn), lambda i, j, k: (i, 0, j)),
                       pl.BlockSpec((1, 1, tn), lambda i, j, k: (i, 0, j))],
            scratch_shapes=[pltpu.VMEM((tm, tn), jnp.float32)]),
        compiler_params=pltpu.CompilerParams(
            dimension_semantics=("parallel", "parallel", "arbitrary"),
            vmem_limit_bytes=_VMEM_LIMIT),
    )(a, b)
    # Tiny reduction over M-tiles (gm values per channel) in plain JAX.
    return out, jnp.sum(psum, axis=0), jnp.sum(psq, axis=0)


# ----------------------------- glue (plain JAX) --------------------------------

def _im2col_3x3(x_pad, stride, Ho, Wo):
    # x_pad: (N, H+2, W+2, C) -> (N*Ho*Wo, 9*C); column order (kh, kw, c)
    N, _, _, C = x_pad.shape
    cols = []
    for kh in range(3):
        for kw in range(3):
            patch = x_pad[:, kh:kh + (Ho - 1) * stride + 1:stride,
                             kw:kw + (Wo - 1) * stride + 1:stride, :]
            cols.append(patch.reshape(N * Ho * Wo, C))
    return jnp.concatenate(cols, axis=1)


def _pad_rows(a, m_pad):
    M = a.shape[0]
    if m_pad == M:
        return a
    return jnp.pad(a, ((0, m_pad - M), (0, 0)))


def _pad_vec(v, cp):
    c = v.shape[0]
    return jnp.pad(v.astype(jnp.float32), (0, cp - c)).reshape(1, cp)


def init_params(key, in_planes, out_planes):
    k = jax.random.split(key, 7)

    def nrm(kk, shape, scale):
        return scale * jax.random.normal(kk, shape, dtype=jnp.float32)

    return dict(
        g1=1.0 + 0.1 * jax.random.normal(k[0], (in_planes,), jnp.float32),
        b1=0.1 * jax.random.normal(k[1], (in_planes,), jnp.float32),
        w1=nrm(k[2], (3, 3, in_planes, out_planes), (2.0 / (9 * in_planes)) ** 0.5),   # HWIO
        g2=1.0 + 0.1 * jax.random.normal(k[3], (out_planes,), jnp.float32),
        b2=0.1 * jax.random.normal(k[4], (out_planes,), jnp.float32),
        w2=nrm(k[5], (3, 3, out_planes, out_planes), (2.0 / (9 * out_planes)) ** 0.5),  # HWIO
        w_sc=nrm(k[6], (1, 1, in_planes, out_planes), (2.0 / in_planes) ** 0.5),        # HWIO
    )


def basic_block_forward(x_nchw, params, stride, drop_rate=0.0):
    # Note: BatchNorm uses training-mode (biased) batch statistics, like the
    # PyTorch module in train(); eval-mode running stats are not reproduced.
    N, Cin, H, W = x_nchw.shape
    Cout = params['w1'].shape[-1]
    in_out_equal = (Cin == Cout)
    if in_out_equal:
        assert stride == 1, "identity shortcut requires stride == 1"

    Cp_in = _round_up(Cin, LANE)
    Cp_out = _round_up(Cout, LANE)

    # NCHW -> NHWC once at the block boundary; pad channels to lane multiples.
    x = jnp.transpose(x_nchw, (0, 2, 3, 1)).astype(jnp.float32)
    xp = jnp.pad(x, ((0, 0), (0, 0), (0, 0), (0, Cp_in - Cin)))

    M1 = N * H * W
    M1p = _round_up(M1, LANE)
    x2d = _pad_rows(xp.reshape(M1, Cp_in), M1p)            # (M1p, Cp_in) f32

    # ---- bn1 + relu1 ----------------------------------------------------------
    g1 = _pad_vec(params['g1'], Cp_in)
    b1 = _pad_vec(params['b1'], Cp_in)
    mean1, var1 = bn_stats(x2d, M1)
    scale1 = g1 * jax.lax.rsqrt(var1 + EPS)
    shift1 = b1 - mean1 * scale1
    h1 = affine_relu(x2d, scale1, shift1, out_dtype=jnp.bfloat16)
    h1 = h1[:M1].reshape(N, H, W, Cp_in)

    Ho = (H + 2 - 3) // stride + 1
    Wo = (W + 2 - 3) // stride + 1
    M2 = N * Ho * Wo
    M2p = _round_up(M2, LANE)

    # ---- conv1: 3x3, stride s, pad 1, with fused BN2 batch statistics ---------
    h1p = jnp.pad(h1, ((0, 0), (1, 1), (1, 1), (0, 0)))
    cols1 = _pad_rows(_im2col_3x3(h1p, stride, Ho, Wo), M2p)     # (M2p, 9*Cp_in) bf16
    w1 = jnp.pad(params['w1'],
                 ((0, 0), (0, 0), (0, Cp_in - Cin), (0, Cp_out - Cout)))
    w1 = w1.reshape(9 * Cp_in, Cp_out).astype(jnp.bfloat16)
    c1, s2, sq2 = matmul_stats(cols1, w1, out_dtype=jnp.float32)  # (M2p, Cp_out)

    # ---- bn2 + relu2 (stats came out of the conv1 epilogue) -------------------
    g2 = _pad_vec(params['g2'], Cp_out)
    b2 = _pad_vec(params['b2'], Cp_out)
    mean2 = s2 / M2
    var2 = jnp.maximum(sq2 / M2 - mean2 * mean2, 0.0)
    scale2 = g2 * jax.lax.rsqrt(var2 + EPS)
    shift2 = b2 - mean2 * scale2
    h2 = affine_relu(c1, scale2, shift2, out_dtype=jnp.bfloat16)
    h2 = h2[:M2].reshape(N, Ho, Wo, Cp_out)

    # ---- conv2 (3x3, stride 1, pad 1) + residual -------------------------------
    h2p = jnp.pad(h2, ((0, 0), (1, 1), (1, 1), (0, 0)))
    cols2 = _pad_rows(_im2col_3x3(h2p, 1, Ho, Wo), M2p)          # (M2p, 9*Cp_out) bf16
    w2 = jnp.pad(params['w2'],
                 ((0, 0), (0, 0), (0, Cp_out - Cout), (0, Cp_out - Cout)))
    w2 = w2.reshape(9 * Cp_out, Cp_out).astype(jnp.bfloat16)

    if in_out_equal:
        # Identity shortcut: original x added once per tile in the matmul epilogue.
        out = matmul_add(cols2, w2, x2d, out_dtype=jnp.float32)
    else:
        # 1x1 shortcut conv folded into the conv2 matmul along K:
        #   out = cols2 @ w2 + sub @ w_sc  in a single MXU pass
        # (the residual tensor is never materialized in HBM).
        sub = _pad_rows(h1[:, ::stride, ::stride, :].reshape(M2, Cp_in), M2p)
        w_sc = jnp.pad(params['w_sc'].reshape(Cin, Cout),
                       ((0, Cp_in - Cin), (0, Cp_out - Cout))).astype(jnp.bfloat16)
        a = jnp.concatenate([cols2, sub.astype(jnp.bfloat16)], axis=1)
        b = jnp.concatenate([w2, w_sc], axis=0)
        out = matmul(a, b, out_dtype=jnp.float32)                # (M2p, Cp_out)

    out = out[:M2, :Cout].reshape(N, Ho, Wo, Cout)
    return jnp.transpose(out, (0, 3, 1, 2))                      # NHWC -> NCHW


# ----------------------------- pure-JAX reference ------------------------------

def ref_forward(x_nchw, params, stride):
    x = jnp.transpose(x_nchw, (0, 2, 3, 1)).astype(jnp.float32)
    Cin = x.shape[-1]
    Cout = params['w1'].shape[-1]

    def bn_relu_ref(t, g, b):
        m = jnp.mean(t, axis=(0, 1, 2), keepdims=True)
        v = jnp.mean((t - m) ** 2, axis=(0, 1, 2), keepdims=True)
        return jnp.maximum((t - m) * jax.lax.rsqrt(v + EPS) * g + b, 0.0)

    def conv(t, w, s, pad):
        return jax.lax.conv_general_dilated(
            t, w, (s, s), pad, dimension_numbers=('NHWC', 'HWIO', 'NHWC'),
            precision=jax.lax.Precision.HIGHEST)

    h1 = bn_relu_ref(x, params['g1'], params['b1'])
    res = x if Cin == Cout else conv(h1, params['w_sc'], stride, 'VALID')
    c1 = conv(h1, params['w1'], stride, ((1, 1), (1, 1)))
    h2 = bn_relu_ref(c1, params['g2'], params['b2'])
    out = conv(h2, params['w2'], 1, ((1, 1), (1, 1))) + res
    return jnp.transpose(out, (0, 3, 1, 2))


if __name__ == "__main__":
    key = jax.random.PRNGKey(0)
    kx1, kp1, kx2, kp2 = jax.random.split(key, 4)

    # Case 1: channel-expanding block (conv shortcut path), stride 2.
    N, Cin, H, W = 2, 4, 16, 16
    Cout, stride = 8, 2
    x1 = jax.random.normal(kx1, (N, Cin, H, W), dtype=jnp.float32)
    p1 = init_params(kp1, Cin, Cout)
    fwd1 = jax.jit(functools.partial(basic_block_forward, stride=stride))
    out1 = jax.block_until_ready(fwd1(x1, p1))
    ref1 = ref_forward(x1, p1, stride)
    assert out1.shape == (N, Cout, H // stride, W // stride), out1.shape
    err1 = float(jnp.max(jnp.abs(out1 - ref1)))
    # bf16 matmul inputs (f32 accumulation) -> looser tolerance than pure f32.
    assert err1 < 1e-1, f"max abs err (shortcut path) {err1}"

    # Case 2: identity-shortcut block (in_planes == out_planes, stride 1).
    x2 = jax.random.normal(kx2, (2, 8, 16, 16), dtype=jnp.float32)
    p2 = init_params(kp2, 8, 8)
    fwd2 = jax.jit(functools.partial(basic_block_forward, stride=1))
    out2 = jax.block_until_ready(fwd2(x2, p2))
    ref2 = ref_forward(x2, p2, 1)
    assert out2.shape == (2, 8, 16, 16), out2.shape
    err2 = float(jnp.max(jnp.abs(out2 - ref2)))
    assert err2 < 1e-1, f"max abs err (identity path) {err2}"

    print("KERNEL_OK")
</pallas_src>

<mosaic_0001>
module attributes {stable_mosaic.version = 11 : i64} {
  func.func @_bn_stats_kernel(%arg0: i32, %arg1: memref<512x128xf32, #tpu.memory_space<vmem>>, %arg2: memref<1x128xf32, #tpu.memory_space<vmem>>, %arg3: memref<1x128xf32, #tpu.memory_space<vmem>>) attributes {dimension_semantics = [#tpu.dimension_semantics<arbitrary>], iteration_bounds = array<i64: 1>, scalar_prefetch = 0 : i64, scratch_operands = 0 : i64, tpu.core_type = #tpu.core_type<tc>, window_params = [{transform_indices = @transform_0, window_bounds = array<i64: 512, 128>}, {pipeline_mode = #tpu.pipeline_mode<synchronous>, transform_indices = @transform_1, window_bounds = array<i64: 1, 128>}, {pipeline_mode = #tpu.pipeline_mode<synchronous>, transform_indices = @transform_2, window_bounds = array<i64: 1, 128>}]} {
    %c0_i32 = arith.constant 0 : i32
    %0 = arith.cmpi eq, %arg0, %c0_i32 : i32
    %1 = arith.extui %0 : i1 to i32
    %c0_i32_0 = arith.constant 0 : i32
    %2 = arith.cmpi ne, %1, %c0_i32_0 : i32
    scf.if %2 {
      %cst_11 = arith.constant 0.000000e+00 : f32
      %15 = vector.broadcast %cst_11 : f32 to vector<1x128xf32>
      %c0_12 = arith.constant 0 : index
      %c0_13 = arith.constant 0 : index
      %16 = vector.load %arg2[%c0_12, %c0_13] : memref<1x128xf32, #tpu.memory_space<vmem>>, vector<1x128xf32>
      tpu.vector_store %arg2[%c0_12, %c0_13], %15 {strides = array<i32>} : memref<1x128xf32, #tpu.memory_space<vmem>>, vector<1x128xf32>,
      %cst_14 = arith.constant 0.000000e+00 : f32
      %17 = vector.broadcast %cst_14 : f32 to vector<1x128xf32>
      %c0_15 = arith.constant 0 : index
      %c0_16 = arith.constant 0 : index
      %18 = vector.load %arg3[%c0_15, %c0_16] : memref<1x128xf32, #tpu.memory_space<vmem>>, vector<1x128xf32>
      tpu.vector_store %arg3[%c0_15, %c0_16], %17 {strides = array<i32>} : memref<1x128xf32, #tpu.memory_space<vmem>>, vector<1x128xf32>,
    } else {
    }
    %c0 = arith.constant 0 : index
    %c0_1 = arith.constant 0 : index
    %3 = vector.load %arg1[%c0, %c0_1] : memref<512x128xf32, #tpu.memory_space<vmem>>, vector<512x128xf32>
    %c0_2 = arith.constant 0 : index
    %c0_3 = arith.constant 0 : index
    %4 = vector.load %arg2[%c0_2, %c0_3] : memref<1x128xf32, #tpu.memory_space<vmem>>, vector<1x128xf32>
    %cst = arith.constant dense<0.000000e+00> : vector<128xf32>
    %5 = vector.multi_reduction <add>, %3, %cst [0] : vector<512x128xf32> to vector<128xf32>
    %6 = vector.shape_cast %5 : vector<128xf32> to vector<1x128xf32>
    %7 = arith.addf %4, %6 : vector<1x128xf32>
    %c0_4 = arith.constant 0 : index
    %c0_5 = arith.constant 0 : index
    %8 = vector.load %arg2[%c0_4, %c0_5] : memref<1x128xf32, #tpu.memory_space<vmem>>, vector<1x128xf32>
    tpu.vector_store %arg2[%c0_4, %c0_5], %7 {strides = array<i32>} : memref<1x128xf32, #tpu.memory_space<vmem>>, vector<1x128xf32>,
    %c0_6 = arith.constant 0 : index
    %c0_7 = arith.constant 0 : index
    %9 = vector.load %arg3[%c0_6, %c0_7] : memref<1x128xf32, #tpu.memory_space<vmem>>, vector<1x128xf32>
    %10 = arith.mulf %3, %3 : vector<512x128xf32>
    %cst_8 = arith.constant dense<0.000000e+00> : vector<128xf32>
    %11 = vector.multi_reduction <add>, %10, %cst_8 [0] : vector<512x128xf32> to vector<128xf32>
    %12 = vector.shape_cast %11 : vector<128xf32> to vector<1x128xf32>
    %13 = arith.addf %9, %12 : vector<1x128xf32>
    %c0_9 = arith.constant 0 : index
    %c0_10 = arith.constant 0 : index
    %14 = vector.load %arg3[%c0_9, %c0_10] : memref<1x128xf32, #tpu.memory_space<vmem>>, vector<1x128xf32>
    tpu.vector_store %arg3[%c0_9, %c0_10], %13 {strides = array<i32>} : memref<1x128xf32, #tpu.memory_space<vmem>>, vector<1x128xf32>,
    return
  }
  func.func @transform_0(%arg0: i32) -> (i32, i32) {
    %c0_i32 = arith.constant 0 : i32
    %c0_i32_0 = arith.constant 0 : i32
    return %arg0, %c0_i32 : i32, i32
  }
  func.func @transform_1(%arg0: i32) -> (i32, i32) {
    %c0_i32 = arith.constant 0 : i32
    %c0_i32_0 = arith.constant 0 : i32
    %c0_i32_1 = arith.constant 0 : i32
    return %c0_i32, %c0_i32_0 : i32, i32
  }
  func.func @transform_2(%arg0: i32) -> (i32, i32) {
    %c0_i32 = arith.constant 0 : i32
    %c0_i32_0 = arith.constant 0 : i32
    %c0_i32_1 = arith.constant 0 : i32
    return %c0_i32, %c0_i32_0 : i32, i32
  }
}

module attributes {stable_mosaic.version = 11 : i64} {
  func.func @_affine_relu_kernel(%arg0: i32, %arg1: memref<512x128xf32, #tpu.memory_space<vmem>>, %arg2: memref<1x128xf32, #tpu.memory_space<vmem>>, %arg3: memref<1x128xf32, #tpu.memory_space<vmem>>, %arg4: memref<512x128xbf16, #tpu.memory_space<vmem>>) attributes {dimension_semantics = [#tpu.dimension_semantics<parallel>], iteration_bounds = array<i64: 1>, scalar_prefetch = 0 : i64, scratch_operands = 0 : i64, tpu.core_type = #tpu.core_type<tc>, window_params = [{transform_indices = @transform_0, window_bounds = array<i64: 512, 128>}, {pipeline_mode = #tpu.pipeline_mode<synchronous>, transform_indices = @transform_1, window_bounds = array<i64: 1, 128>}, {pipeline_mode = #tpu.pipeline_mode<synchronous>, transform_indices = @transform_2, window_bounds = array<i64: 1, 128>}, {transform_indices = @transform_3, window_bounds = array<i64: 512, 128>}]} {
    %c0 = arith.constant 0 : index
    %c0_0 = arith.constant 0 : index
    %0 = vector.load %arg1[%c0, %c0_0] : memref<512x128xf32, #tpu.memory_space<vmem>>, vector<512x128xf32>
    %c0_1 = arith.constant 0 : index
    %c0_2 = arith.constant 0 : index
    %1 = vector.load %arg2[%c0_1, %c0_2] : memref<1x128xf32, #tpu.memory_space<vmem>>, vector<1x128xf32>
    %2 = vector.broadcast %1 : vector<1x128xf32> to vector<512x128xf32>
    %3 = arith.mulf %0, %2 : vector<512x128xf32>
    %c0_3 = arith.constant 0 : index
    %c0_4 = arith.constant 0 : index
    %4 = vector.load %arg3[%c0_3, %c0_4] : memref<1x128xf32, #tpu.memory_space<vmem>>, vector<1x128xf32>
    %5 = vector.broadcast %4 : vector<1x128xf32> to vector<512x128xf32>
    %6 = arith.addf %3, %5 : vector<512x128xf32>
    %cst = arith.constant 0.000000e+00 : f32
    %7 = vector.broadcast %cst : f32 to vector<512x128xf32>
    %8 = arith.maximumf %6, %7 : vector<512x128xf32>
    %9 = arith.truncf %8 : vector<512x128xf32> to vector<512x128xbf16>
    %c0_5 = arith.constant 0 : index
    %c0_6 = arith.constant 0 : index
    %10 = vector.load %arg4[%c0_5, %c0_6] : memref<512x128xbf16, #tpu.memory_space<vmem>>, vector<512x128xbf16>
    tpu.vector_store %arg4[%c0_5, %c0_6], %9 {strides = array<i32>} : memref<512x128xbf16, #tpu.memory_space<vmem>>, vector<512x128xbf16>,
    return
  }
  func.func @transform_0(%arg0: i32) -> (i32, i32) {
    %c0_i32 = arith.constant 0 : i32
    %c0_i32_0 = arith.constant 0 : i32
    return %arg0, %c0_i32 : i32, i32
  }
  func.func @transform_1(%arg0: i32) -> (i32, i32) {
    %c0_i32 = arith.constant 0 : i32
    %c0_i32_0 = arith.constant 0 : i32
    %c0_i32_1 = arith.constant 0 : i32
    return %c0_i32, %c0_i32_0 : i32, i32
  }
  func.func @transform_2(%arg0: i32) -> (i32, i32) {
    %c0_i32 = arith.constant 0 : i32
    %c0_i32_0 = arith.constant 0 : i32
    %c0_i32_1 = arith.constant 0 : i32
    return %c0_i32, %c0_i32_0 : i32, i32
  }
  func.func @transform_3(%arg0: i32) -> (i32, i32) {
    %c0_i32 = arith.constant 0 : i32
    %c0_i32_0 = arith.constant 0 : i32
    return %arg0, %c0_i32 : i32, i32
  }
}

module attributes {stable_mosaic.version = 11 : i64} {
  func.func @_matmul_stats_kernel(%arg0: i32, %arg1: i32, %arg2: i32, %arg3: memref<128x384xbf16, #tpu.memory_space<vmem>>, %arg4: memref<384x128xbf16, #tpu.memory_space<vmem>>, %arg5: memref<128x128xf32, #tpu.memory_space<vmem>>, %arg6: memref<1x1x128xf32, #tpu.memory_space<vmem>>, %arg7: memref<1x1x128xf32, #tpu.memory_space<vmem>>, %arg8: memref<128x128xf32, #tpu.memory_space<vmem>>) attributes {dimension_semantics = [#tpu.dimension_semantics<parallel>, #tpu.dimension_semantics<parallel>, #tpu.dimension_semantics<arbitrary>], iteration_bounds = array<i64: 1, 1, 3>, scalar_prefetch = 0 : i64, scratch_operands = 1 : i64, tpu.core_type = #tpu.core_type<tc>, window_params = [{transform_indices = @transform_0, window_bounds = array<i64: 128, 384>}, {transform_indices = @transform_1, window_bounds = array<i64: 384, 128>}, {transform_indices = @transform_2, window_bounds = array<i64: 128, 128>}, {transform_indices = @transform_3, window_bounds = array<i64: 1, 1, 128>}, {transform_indices = @transform_4, window_bounds = array<i64: 1, 1, 128>}]} {
    %c0_i32 = arith.constant 0 : i32
    %0 = arith.cmpi eq, %arg2, %c0_i32 : i32
    %1 = arith.extui %0 : i1 to i32
    %c0_i32_0 = arith.constant 0 : i32
    %2 = arith.cmpi ne, %1, %c0_i32_0 : i32
    scf.if %2 {
      %cst_9 = arith.constant 0.000000e+00 : f32
      %12 = vector.broadcast %cst_9 : f32 to vector<128x128xf32>
      %c0_10 = arith.constant 0 : index
      %c0_11 = arith.constant 0 : index
      %13 = vector.load %arg8[%c0_10, %c0_11] : memref<128x128xf32, #tpu.memory_space<vmem>>, vector<128x128xf32>
      tpu.vector_store %arg8[%c0_10, %c0_11], %12 {strides = array<i32>} : memref<128x128xf32, #tpu.memory_space<vmem>>, vector<128x128xf32>,
    } else {
    }
    %c0 = arith.constant 0 : index
    %c0_1 = arith.constant 0 : index
    %3 = vector.load %arg8[%c0, %c0_1] : memref<128x128xf32, #tpu.memory_space<vmem>>, vector<128x128xf32>
    %c0_2 = arith.constant 0 : index
    %c0_3 = arith.constant 0 : index
    %4 = vector.load %arg3[%c0_2, %c0_3] : memref<128x384xbf16, #tpu.memory_space<vmem>>, vector<128x384xbf16>
    %c0_4 = arith.constant 0 : index
    %c0_5 = arith.constant 0 : index
    %5 = vector.load %arg4[%c0_4, %c0_5] : memref<384x128xbf16, #tpu.memory_space<vmem>>, vector<384x128xbf16>
    %cst = arith.constant dense<0.000000e+00> : vector<128x128xf32>
    %6 = tpu.matmul %4, %5, %cst {dimension_numbers = #tpu.dot_dimension_numbers<[1], [0], [0], [1], [0, 0, 1, 1], [], []>} : vector<128x384xbf16>, vector<384x128xbf16>, vector<128x128xf32> -> vector<128x128xf32>
    %7 = arith.addf %3, %6 : vector<128x128xf32>
    %c0_6 = arith.constant 0 : index
    %c0_7 = arith.constant 0 : index
    %8 = vector.load %arg8[%c0_6, %c0_7] : memref<128x128xf32, #tpu.memory_space<vmem>>, vector<128x128xf32>
    tpu.vector_store %arg8[%c0_6, %c0_7], %7 {strides = array<i32>} : memref<128x128xf32, #tpu.memory_space<vmem>>, vector<128x128xf32>,
    %c2_i32 = arith.constant 2 : i32
    %9 = arith.cmpi eq, %arg2, %c2_i32 : i32
    %10 = arith.extui %9 : i1 to i32
    %c0_i32_8 = arith.constant 0 : i32
    %11 = arith.cmpi ne, %10, %c0_i32_8 : i32
    scf.if %11 {
      %c0_9 = arith.constant 0 : index
      %c0_10 = arith.constant 0 : index
      %12 = vector.load %arg8[%c0_9, %c0_10] : memref<128x128xf32, #tpu.memory_space<vmem>>, vector<128x128xf32>
      %c0_11 = arith.constant 0 : index
      %c0_12 = arith.constant 0 : index
      %13 = vector.load %arg5[%c0_11, %c0_12] : memref<128x128xf32, #tpu.memory_space<vmem>>, vector<128x128xf32>
      tpu.vector_store %arg5[%c0_11, %c0_12], %12 {strides = array<i32>} : memref<128x128xf32, #tpu.memory_space<vmem>>, vector<128x128xf32>,
      %cst_13 = arith.constant dense<0.000000e+00> : vector<128xf32>
      %14 = vector.multi_reduction <add>, %12, %cst_13 [0] : vector<128x128xf32> to vector<128xf32>
      %15 = vector.shape_cast %14 : vector<128xf32> to vector<1x128xf32>
      %16 = vector.shape_cast %15 : vector<1x128xf32> to vector<1x1x128xf32>
      %c0_14 = arith.constant 0 : index
      %c0_15 = arith.constant 0 : index
      %c0_16 = arith.constant 0 : index
      %17 = vector.load %arg6[%c0_14, %c0_15, %c0_16] : memref<1x1x128xf32, #tpu.memory_space<vmem>>, vector<1x1x128xf32>
      tpu.vector_store %arg6[%c0_14, %c0_15, %c0_16], %16 {strides = array<i32>} : memref<1x1x128xf32, #tpu.memory_space<vmem>>, vector<1x1x128xf32>,
      %18 = arith.mulf %12, %12 : vector<128x128xf32>
      %cst_17 = arith.constant dense<0.000000e+00> : vector<128xf32>
      %19 = vector.multi_reduction <add>, %18, %cst_17 [0] : vector<128x128xf32> to vector<128xf32>
      %20 = vector.shape_cast %19 : vector<128xf32> to vector<1x128xf32>
      %21 = vector.shape_cast %20 : vector<1x128xf32> to vector<1x1x128xf32>
      %c0_18 = arith.constant 0 : index
      %c0_19 = arith.constant 0 : index
      %c0_20 = arith.constant 0 : index
      %22 = vector.load %arg7[%c0_18, %c0_19, %c0_20] : memref<1x1x128xf32, #tpu.memory_space<vmem>>, vector<1x1x128xf32>
      tpu.vector_store %arg7[%c0_18, %c0_19, %c0_20], %21 {strides = array<i32>} : memref<1x1x128xf32, #tpu.memory_space<vmem>>, vector<1x1x128xf32>,
    } else {
    }
    return
  }
  func.func @transform_0(%arg0: i32, %arg1: i32, %arg2: i32) -> (i32, i32) {
    %c0_i32 = arith.constant 0 : i32
    return %arg0, %arg2 : i32, i32
  }
  func.func @transform_1(%arg0: i32, %arg1: i32, %arg2: i32) -> (i32, i32) {
    %c0_i32 = arith.constant 0 : i32
    return %arg2, %arg1 : i32, i32
  }
  func.func @transform_2(%arg0: i32, %arg1: i32, %arg2: i32) -> (i32, i32) {
    %c0_i32 = arith.constant 0 : i32
    return %arg0, %arg1 : i32, i32
  }
  func.func @transform_3(%arg0: i32, %arg1: i32, %arg2: i32) -> (i32, i32, i32) {
    %c0_i32 = arith.constant 0 : i32
    %c0_i32_0 = arith.constant 0 : i32
    return %arg0, %c0_i32, %arg1 : i32, i32, i32
  }
  func.func @transform_4(%arg0: i32, %arg1: i32, %arg2: i32) -> (i32, i32, i32) {
    %c0_i32 = arith.constant 0 : i32
    %c0_i32_0 = arith.constant 0 : i32
    return %arg0, %c0_i32, %arg1 : i32, i32, i32
  }
}

module attributes {stable_mosaic.version = 11 : i64} {
  func.func @_affine_relu_kernel(%arg0: i32, %arg1: memref<128x128xf32, #tpu.memory_space<vmem>>, %arg2: memref<1x128xf32, #tpu.memory_space<vmem>>, %arg3: memref<1x128xf32, #tpu.memory_space<vmem>>, %arg4: memref<128x128xbf16, #tpu.memory_space<vmem>>) attributes {dimension_semantics = [#tpu.dimension_semantics<parallel>], iteration_bounds = array<i64: 1>, scalar_prefetch = 0 : i64, scratch_operands = 0 : i64, tpu.core_type = #tpu.core_type<tc>, window_params = [{transform_indices = @transform_0, window_bounds = array<i64: 128, 128>}, {pipeline_mode = #tpu.pipeline_mode<synchronous>, transform_indices = @transform_1, window_bounds = array<i64: 1, 128>}, {pipeline_mode = #tpu.pipeline_mode<synchronous>, transform_indices = @transform_2, window_bounds = array<i64: 1, 128>}, {transform_indices = @transform_3, window_bounds = array<i64: 128, 128>}]} {
    %c0 = arith.constant 0 : index
    %c0_0 = arith.constant 0 : index
    %0 = vector.load %arg1[%c0, %c0_0] : memref<128x128xf32, #tpu.memory_space<vmem>>, vector<128x128xf32>
    %c0_1 = arith.constant 0 : index
    %c0_2 = arith.constant 0 : index
    %1 = vector.load %arg2[%c0_1, %c0_2] : memref<1x128xf32, #tpu.memory_space<vmem>>, vector<1x128xf32>
    %2 = vector.broadcast %1 : vector<1x128xf32> to vector<128x128xf32>
    %3 = arith.mulf %0, %2 : vector<128x128xf32>
    %c0_3 = arith.constant 0 : index
    %c0_4 = arith.constant 0 : index
    %4 = vector.load %arg3[%c0_3, %c0_4] : memref<1x128xf32, #tpu.memory_space<vmem>>, vector<1x128xf32>
    %5 = vector.broadcast %4 : vector<1x128xf32> to vector<128x128xf32>
    %6 = arith.addf %3, %5 : vector<128x128xf32>
    %cst = arith.constant 0.000000e+00 : f32
    %7 = vector.broadcast %cst : f32 to vector<128x128xf32>
    %8 = arith.maximumf %6, %7 : vector<128x128xf32>
    %9 = arith.truncf %8 : vector<128x128xf32> to vector<128x128xbf16>
    %c0_5 = arith.constant 0 : index
    %c0_6 = arith.constant 0 : index
    %10 = vector.load %arg4[%c0_5, %c0_6] : memref<128x128xbf16, #tpu.memory_space<vmem>>, vector<128x128xbf16>
    tpu.vector_store %arg4[%c0_5, %c0_6], %9 {strides = array<i32>} : memref<128x128xbf16, #tpu.memory_space<vmem>>, vector<128x128xbf16>,
    return
  }
  func.func @transform_0(%arg0: i32) -> (i32, i32) {
    %c0_i32 = arith.constant 0 : i32
    %c0_i32_0 = arith.constant 0 : i32
    return %arg0, %c0_i32 : i32, i32
  }
  func.func @transform_1(%arg0: i32) -> (i32, i32) {
    %c0_i32 = arith.constant 0 : i32
    %c0_i32_0 = arith.constant 0 : i32
    %c0_i32_1 = arith.constant 0 : i32
    return %c0_i32, %c0_i32_0 : i32, i32
  }
  func.func @transform_2(%arg0: i32) -> (i32, i32) {
    %c0_i32 = arith.constant 0 : i32
    %c0_i32_0 = arith.constant 0 : i32
    %c0_i32_1 = arith.constant 0 : i32
    return %c0_i32, %c0_i32_0 : i32, i32
  }
  func.func @transform_3(%arg0: i32) -> (i32, i32) {
    %c0_i32 = arith.constant 0 : i32
    %c0_i32_0 = arith.constant 0 : i32
    return %arg0, %c0_i32 : i32, i32
  }
}

module attributes {stable_mosaic.version = 11 : i64} {
  func.func @_matmul_kernel(%arg0: i32, %arg1: i32, %arg2: i32, %arg3: memref<128x256xbf16, #tpu.memory_space<vmem>>, %arg4: memref<256x128xbf16, #tpu.memory_space<vmem>>, %arg5: memref<128x128xf32, #tpu.memory_space<vmem>>, %arg6: memref<128x128xf32, #tpu.memory_space<vmem>>) attributes {dimension_semantics = [#tpu.dimension_semantics<parallel>, #tpu.dimension_semantics<parallel>, #tpu.dimension_semantics<arbitrary>], iteration_bounds = array<i64: 1, 1, 5>, scalar_prefetch = 0 : i64, scratch_operands = 1 : i64, tpu.core_type = #tpu.core_type<tc>, window_params = [{transform_indices = @transform_0, window_bounds = array<i64: 128, 256>}, {transform_indices = @transform_1, window_bounds = array<i64: 256, 128>}, {transform_indices = @transform_2, window_bounds = array<i64: 128, 128>}]} {
    %c0_i32 = arith.constant 0 : i32
    %0 = arith.cmpi eq, %arg2, %c0_i32 : i32
    %1 = arith.extui %0 : i1 to i32
    %c0_i32_0 = arith.constant 0 : i32
    %2 = arith.cmpi ne, %1, %c0_i32_0 : i32
    scf.if %2 {
      %cst_9 = arith.constant 0.000000e+00 : f32
      %12 = vector.broadcast %cst_9 : f32 to vector<128x128xf32>
      %c0_10 = arith.constant 0 : index
      %c0_11 = arith.constant 0 : index
      %13 = vector.load %arg6[%c0_10, %c0_11] : memref<128x128xf32, #tpu.memory_space<vmem>>, vector<128x128xf32>
      tpu.vector_store %arg6[%c0_10, %c0_11], %12 {strides = array<i32>} : memref<128x128xf32, #tpu.memory_space<vmem>>, vector<128x128xf32>,
    } else {
    }
    %c0 = arith.constant 0 : index
    %c0_1 = arith.constant 0 : index
    %3 = vector.load %arg6[%c0, %c0_1] : memref<128x128xf32, #tpu.memory_space<vmem>>, vector<128x128xf32>
    %c0_2 = arith.constant 0 : index
    %c0_3 = arith.constant 0 : index
    %4 = vector.load %arg3[%c0_2, %c0_3] : memref<128x256xbf16, #tpu.memory_space<vmem>>, vector<128x256xbf16>
    %c0_4 = arith.constant 0 : index
    %c0_5 = arith.constant 0 : index
    %5 = vector.load %arg4[%c0_4, %c0_5] : memref<256x128xbf16, #tpu.memory_space<vmem>>, vector<256x128xbf16>
    %cst = arith.constant dense<0.000000e+00> : vector<128x128xf32>
    %6 = tpu.matmul %4, %5, %cst {dimension_numbers = #tpu.dot_dimension_numbers<[1], [0], [0], [1], [0, 0, 1, 1], [], []>} : vector<128x256xbf16>, vector<256x128xbf16>, vector<128x128xf32> -> vector<128x128xf32>
    %7 = arith.addf %3, %6 : vector<128x128xf32>
    %c0_6 = arith.constant 0 : index
    %c0_7 = arith.constant 0 : index
    %8 = vector.load %arg6[%c0_6, %c0_7] : memref<128x128xf32, #tpu.memory_space<vmem>>, vector<128x128xf32>
    tpu.vector_store %arg6[%c0_6, %c0_7], %7 {strides = array<i32>} : memref<128x128xf32, #tpu.memory_space<vmem>>, vector<128x128xf32>,
    %c4_i32 = arith.constant 4 : i32
    %9 = arith.cmpi eq, %arg2, %c4_i32 : i32
    %10 = arith.extui %9 : i1 to i32
    %c0_i32_8 = arith.constant 0 : i32
    %11 = arith.cmpi ne, %10, %c0_i32_8 : i32
    scf.if %11 {
      %c0_9 = arith.constant 0 : index
      %c0_10 = arith.constant 0 : index
      %12 = vector.load %arg6[%c0_9, %c0_10] : memref<128x128xf32, #tpu.memory_space<vmem>>, vector<128x128xf32>
      %c0_11 = arith.constant 0 : index
      %c0_12 = arith.constant 0 : index
      %13 = vector.load %arg5[%c0_11, %c0_12] : memref<128x128xf32, #tpu.memory_space<vmem>>, vector<128x128xf32>
      tpu.vector_store %arg5[%c0_11, %c0_12], %12 {strides = array<i32>} : memref<128x128xf32, #tpu.memory_space<vmem>>, vector<128x128xf32>,
    } else {
    }
    return
  }
  func.func @transform_0(%arg0: i32, %arg1: i32, %arg2: i32) -> (i32, i32) {
    %c0_i32 = arith.constant 0 : i32
    return %arg0, %arg2 : i32, i32
  }
  func.func @transform_1(%arg0: i32, %arg1: i32, %arg2: i32) -> (i32, i32) {
    %c0_i32 = arith.constant 0 : i32
    return %arg2, %arg1 : i32, i32
  }
  func.func @transform_2(%arg0: i32, %arg1: i32, %arg2: i32) -> (i32, i32) {
    %c0_i32 = arith.constant 0 : i32
    return %arg0, %arg1 : i32, i32
  }
}

</mosaic_0001>

<bundles_post_ra>
// kernel: basic_block_forward.5
= control target key start
LH: loop header
LB: loop body
LE: loop exit
PB: predicated region body
PF: predicated region fallthrough
CT: control target
= control target key end

     0   :  { %v297_v0 = vmov 0.0   ;;  %s523_s0 = inlined_call_operand.vmem [shape: f32[512,128], index: 0, kind: input, shape index: {}]   ;;  %s524_s1 = inlined_call_operand.vmem [shape: f32[1,128], index: 1, kind: output, shape index: {0}]   ;;  %s525_s2 = inlined_call_operand.vmem [shape: f32[1,128], index: 2, kind: output, shape index: {1}]  }
   0x1   :  { %14 = vst [vmem:[%s524_s1] sm:$0x1] %v297_v0  ;;  %15 = vst [vmem:[%s525_s2] sm:$0x1] %v297_v0  ;;  %v16_v1 = vld [vmem:[%s523_s0] sm:$0xff]  ;;  %v17_v2 = vld [vmem:[%s523_s0 + $0x8] sm:$0xff] }
   0x2   :  { %v18_v3 = vld [vmem:[%s523_s0 + $0x10] sm:$0xff]  ;;  %v19_v4 = vld [vmem:[%s523_s0 + $0x18] sm:$0xff]  ;;  %v81_v5 = vadd.f32 %v17_v2, %v16_v1  ;;  %v153_v6 = vmul.f32 %v16_v1, %v16_v1  ;;  %v154_v7 = vmul.f32 %v17_v2, %v17_v2  ;;  %v20_v9 = vld [vmem:[%s523_s0 + $0x20] sm:$0xff] }
   0x3   :  { %v155_v8 = vmul.f32 %v18_v3, %v18_v3  ;;  %v156_v11 = vmul.f32 %v19_v4, %v19_v4  ;;  %v21_v13 = vld [vmem:[%s523_s0 + $0x28] sm:$0xff]  ;;  %v157_v15 = vmul.f32 %v20_v9, %v20_v9  ;;  %v22_v17 = vld [vmem:[%s523_s0 + $0x30] sm:$0xff]  ;;  %v23_v21 = vld [vmem:[%s523_s0 + $0x38] sm:$0xff] }
   0x4   :  { %v82_v10 = vadd.f32 %v81_v5, %v18_v3  ;;  %v217_v12 = vadd.f32 %v154_v7, %v153_v6  ;;  %v158_v19 = vmul.f32 %v21_v13, %v21_v13  ;;  %v159_v23 = vmul.f32 %v22_v17, %v22_v17  ;;  %v24_v25 = vld [vmem:[%s523_s0 + $0x40] sm:$0xff]  ;;  %v25_v29 = vld [vmem:[%s523_s0 + $0x48] sm:$0xff]  ;;  %v26_v33 = vld [vmem:[%s523_s0 + $0x50] sm:$0xff] }
   0x5   :  { %v160_v27 = vmul.f32 %v23_v21, %v23_v21  ;;  %v161_v31 = vmul.f32 %v24_v25, %v24_v25  ;;  %v162_v35 = vmul.f32 %v25_v29, %v25_v29  ;;  %v27_v37 = vld [vmem:[%s523_s0 + $0x58] sm:$0xff]  ;;  %v163_v39 = vmul.f32 %v26_v33, %v26_v33  ;;  %v28_v41 = vld [vmem:[%s523_s0 + $0x60] sm:$0xff]  ;;  %v29_v45 = vld [vmem:[%s523_s0 + $0x68] sm:$0xff] }
   0x6   :  { %v83_v14 = vadd.f32 %v82_v10, %v19_v4  ;;  %v218_v16 = vadd.f32 %v217_v12, %v155_v8  ;;  %v164_v43 = vmul.f32 %v27_v37, %v27_v37  ;;  %v165_v47 = vmul.f32 %v28_v41, %v28_v41  ;;  %v30_v49 = vld [vmem:[%s523_s0 + $0x70] sm:$0xff]  ;;  %v31_v53 = vld [vmem:[%s523_s0 + $0x78] sm:$0xff]  ;;  %v32_v57 = vld [vmem:[%s523_s0 + $0x80] sm:$0xff] }
   0x7   :  { %v166_v51 = vmul.f32 %v29_v45, %v29_v45  ;;  %v167_v55 = vmul.f32 %v30_v49, %v30_v49  ;;  %v168_v59 = vmul.f32 %v31_v53, %v31_v53  ;;  %v33_v61 = vld [vmem:[%s523_s0 + $0x88] sm:$0xff]  ;;  %v169_v63 = vmul.f32 %v32_v57, %v32_v57  ;;  %v34_v1 = vld [vmem:[%s523_s0 + $0x90] sm:$0xff]  ;;  %v35_v5 = vld [vmem:[%s523_s0 + $0x98] sm:$0xff] }
   0x8   :  { %v84_v18 = vadd.f32 %v83_v14, %v20_v9  ;;  %v219_v20 = vadd.f32 %v218_v16, %v156_v11  ;;  %v170_v3 = vmul.f32 %v33_v61, %v33_v61  ;;  %v171_v7 = vmul.f32 %v34_v1, %v34_v1  ;;  %v36_v9 = vld [vmem:[%s523_s0 + $0xa0] sm:$0xff] }
   0x9   :  { %v172_v11 = vmul.f32 %v35_v5, %v35_v5 }
   0xa   :  { %v85_v22 = vadd.f32 %v84_v18, %v21_v13  ;;  %v220_v24 = vadd.f32 %v219_v20, %v157_v15  ;;  %v37_v13 = vld [vmem:[%s523_s0 + $0xa8] sm:$0xff]  ;;  %v173_v15 = vmul.f32 %v36_v9, %v36_v9 }
   0xc   :  { %v86_v26 = vadd.f32 %v85_v22, %v22_v17  ;;  %v221_v28 = vadd.f32 %v220_v24, %v158_v19  ;;  %v38_v17 = vld [vmem:[%s523_s0 + $0xb0] sm:$0xff]  ;;  %v174_v19 = vmul.f32 %v37_v13, %v37_v13 }
   0xe   :  { %v87_v30 = vadd.f32 %v86_v26, %v23_v21  ;;  %v222_v32 = vadd.f32 %v221_v28, %v159_v23  ;;  %v39_v21 = vld [vmem:[%s523_s0 + $0xb8] sm:$0xff]  ;;  %v175_v23 = vmul.f32 %v38_v17, %v38_v17 }
  0x10   :  { %v88_v34 = vadd.f32 %v87_v30, %v24_v25  ;;  %v223_v36 = vadd.f32 %v222_v32, %v160_v27  ;;  %v40_v25 = vld [vmem:[%s523_s0 + $0xc0] sm:$0xff]  ;;  %v176_v27 = vmul.f32 %v39_v21, %v39_v21 }
  0x12   :  { %v89_v38 = vadd.f32 %v88_v34, %v25_v29  ;;  %v224_v40 = vadd.f32 %v223_v36, %v161_v31  ;;  %v41_v29 = vld [vmem:[%s523_s0 + $0xc8] sm:$0xff]  ;;  %v177_v31 = vmul.f32 %v40_v25, %v40_v25 }
  0x14   :  { %v90_v42 = vadd.f32 %v89_v38, %v26_v33  ;;  %v225_v44 = vadd.f32 %v224_v40, %v162_v35  ;;  %v42_v33 = vld [vmem:[%s523_s0 + $0xd0] sm:$0xff]  ;;  %v178_v35 = vmul.f32 %v41_v29, %v41_v29 }
  0x16   :  { %v91_v46 = vadd.f32 %v90_v42, %v27_v37  ;;  %v226_v48 = vadd.f32 %v225_v44, %v163_v39  ;;  %v43_v37 = vld [vmem:[%s523_s0 + $0xd8] sm:$0xff]  ;;  %v179_v39 = vmul.f32 %v42_v33, %v42_v33 }
  0x18   :  { %v92_v50 = vadd.f32 %v91_v46, %v28_v41  ;;  %v227_v52 = vadd.f32 %v226_v48, %v164_v43  ;;  %v44_v41 = vld [vmem:[%s523_s0 + $0xe0] sm:$0xff]  ;;  %v180_v43 = vmul.f32 %v43_v37, %v43_v37 }
  0x1a   :  { %v93_v54 = vadd.f32 %v92_v50, %v29_v45  ;;  %v228_v56 = vadd.f32 %v227_v52, %v165_v47  ;;  %v45_v45 = vld [vmem:[%s523_s0 + $0xe8] sm:$0xff]  ;;  %v181_v47 = vmul.f32 %v44_v41, %v44_v41 }
  0x1c   :  { %v94_v58 = vadd.f32 %v93_v54, %v30_v49  ;;  %v229_v60 = vadd.f32 %v228_v56, %v166_v51  ;;  %v46_v49 = vld [vmem:[%s523_s0 + $0xf0] sm:$0xff]  ;;  %v182_v51 = vmul.f32 %v45_v45, %v45_v45 }
  0x1e   :  { %v95_v62 = vadd.f32 %v94_v58, %v31_v53  ;;  %v230_v0 = vadd.f32 %v229_v60, %v167_v55  ;;  %v47_v53 = vld [vmem:[%s523_s0 + $0xf8] sm:$0xff]  ;;  %v183_v55 = vmul.f32 %v46_v49, %v46_v49 }
  0x20   :  { %v96_v2 = vadd.f32 %v95_v62, %v32_v57  ;;  %v231_v4 = vadd.f32 %v230_v0, %v168_v59  ;;  %v48_v57 = vld [vmem:[%s523_s0 + $0x100] sm:$0xff]  ;;  %v184_v59 = vmul.f32 %v47_v53, %v47_v53 }
  0x22   :  { %v97_v6 = vadd.f32 %v96_v2, %v33_v61  ;;  %v232_v8 = vadd.f32 %v231_v4, %v169_v63  ;;  %v49_v61 = vld [vmem:[%s523_s0 + $0x108] sm:$0xff]  ;;  %v185_v63 = vmul.f32 %v48_v57, %v48_v57 }
  0x24   :  { %v98_v10 = vadd.f32 %v97_v6, %v34_v1  ;;  %v233_v12 = vadd.f32 %v232_v8, %v170_v3  ;;  %v50_v1 = vld [vmem:[%s523_s0 + $0x110] sm:$0xff]  ;;  %v186_v3 = vmul.f32 %v49_v61, %v49_v61 }
  0x26   :  { %v99_v14 = vadd.f32 %v98_v10, %v35_v5  ;;  %v234_v16 = vadd.f32 %v233_v12, %v171_v7  ;;  %v51_v5 = vld [vmem:[%s523_s0 + $0x118] sm:$0xff]  ;;  %v187_v7 = vmul.f32 %v50_v1, %v50_v1 }
  0x28   :  { %v100_v18 = vadd.f32 %v99_v14, %v36_v9  ;;  %v235_v20 = vadd.f32 %v234_v16, %v172_v11  ;;  %v52_v9 = vld [vmem:[%s523_s0 + $0x120] sm:$0xff]  ;;  %v188_v11 = vmul.f32 %v51_v5, %v51_v5 }
  0x2a   :  { %v101_v22 = vadd.f32 %v100_v18, %v37_v13  ;;  %v236_v24 = vadd.f32 %v235_v20, %v173_v15  ;;  %v53_v13 = vld [vmem:[%s523_s0 + $0x128] sm:$0xff]  ;;  %v189_v15 = vmul.f32 %v52_v9, %v52_v9 }
  0x2c   :  { %v102_v26 = vadd.f32 %v101_v22, %v38_v17  ;;  %v237_v28 = vadd.f32 %v236_v24, %v174_v19  ;;  %v54_v17 = vld [vmem:[%s523_s0 + $0x130] sm:$0xff]  ;;  %v190_v19 = vmul.f32 %v53_v13, %v53_v13 }
  0x2e   :  { %v103_v30 = vadd.f32 %v102_v26, %v39_v21  ;;  %v238_v32 = vadd.f32 %v237_v28, %v175_v23  ;;  %v55_v21 = vld [vmem:[%s523_s0 + $0x138] sm:$0xff]  ;;  %v191_v23 = vmul.f32 %v54_v17, %v54_v17 }
  0x30   :  { %v104_v34 = vadd.f32 %v103_v30, %v40_v25  ;;  %v239_v36 = vadd.f32 %v238_v32, %v176_v27  ;;  %v56_v25 = vld [vmem:[%s523_s0 + $0x140] sm:$0xff]  ;;  %v192_v27 = vmul.f32 %v55_v21, %v55_v21 }
  0x32   :  { %v105_v38 = vadd.f32 %v104_v34, %v41_v29  ;;  %v240_v40 = vadd.f32 %v239_v36, %v177_v31  ;;  %v57_v29 = vld [vmem:[%s523_s0 + $0x148] sm:$0xff]  ;;  %v193_v31 = vmul.f32 %v56_v25, %v56_v25 }
  0x34   :  { %v106_v42 = vadd.f32 %v105_v38, %v42_v33  ;;  %v241_v44 = vadd.f32 %v240_v40, %v178_v35  ;;  %v58_v33 = vld [vmem:[%s523_s0 + $0x150] sm:$0xff]  ;;  %v194_v35 = vmul.f32 %v57_v29, %v57_v29 }
  0x36   :  { %v107_v46 = vadd.f32 %v106_v42, %v43_v37  ;;  %v242_v48 = vadd.f32 %v241_v44, %v179_v39  ;;  %v59_v37 = vld [vmem:[%s523_s0 + $0x158] sm:$0xff]  ;;  %v195_v39 = vmul.f32 %v58_v33, %v58_v33 }
  0x38   :  { %v108_v50 = vadd.f32 %v107_v46, %v44_v41  ;;  %v243_v52 = vadd.f32 %v242_v48, %v180_v43  ;;  %v60_v41 = vld [vmem:[%s523_s0 + $0x160] sm:$0xff]  ;;  %v196_v43 = vmul.f32 %v59_v37, %v59_v37 }
  0x3a   :  { %v109_v54 = vadd.f32 %v108_v50, %v45_v45  ;;  %v244_v56 = vadd.f32 %v243_v52, %v181_v47  ;;  %v61_v45 = vld [vmem:[%s523_s0 + $0x168] sm:$0xff]  ;;  %v197_v47 = vmul.f32 %v60_v41, %v60_v41 }
  0x3c   :  { %v110_v58 = vadd.f32 %v109_v54, %v46_v49  ;;  %v245_v60 = vadd.f32 %v244_v56, %v182_v51  ;;  %v62_v49 = vld [vmem:[%s523_s0 + $0x170] sm:$0xff]  ;;  %v198_v51 = vmul.f32 %v61_v45, %v61_v45 }
  0x3e   :  { %v111_v62 = vadd.f32 %v110_v58, %v47_v53  ;;  %v246_v0 = vadd.f32 %v245_v60, %v183_v55  ;;  %v63_v53 = vld [vmem:[%s523_s0 + $0x178] sm:$0xff]  ;;  %v199_v55 = vmul.f32 %v62_v49, %v62_v49 }
  0x40   :  { %v112_v2 = vadd.f32 %v111_v62, %v48_v57  ;;  %v247_v4 = vadd.f32 %v246_v0, %v184_v59  ;;  %v64_v57 = vld [vmem:[%s523_s0 + $0x180] sm:$0xff]  ;;  %v200_v59 = vmul.f32 %v63_v53, %v63_v53 }
  0x42   :  { %v113_v6 = vadd.f32 %v112_v2, %v49_v61  ;;  %v248_v8 = vadd.f32 %v247_v4, %v185_v63  ;;  %v65_v61 = vld [vmem:[%s523_s0 + $0x188] sm:$0xff]  ;;  %v201_v63 = vmul.f32 %v64_v57, %v64_v57 }
  0x44   :  { %v114_v10 = vadd.f32 %v113_v6, %v50_v1  ;;  %v249_v12 = vadd.f32 %v248_v8, %v186_v3  ;;  %v66_v1 = vld [vmem:[%s523_s0 + $0x190] sm:$0xff]  ;;  %v202_v3 = vmul.f32 %v65_v61, %v65_v61 }
  0x46   :  { %v115_v14 = vadd.f32 %v114_v10, %v51_v5  ;;  %v250_v16 = vadd.f32 %v249_v12, %v187_v7  ;;  %v67_v5 = vld [vmem:[%s523_s0 + $0x198] sm:$0xff]  ;;  %v203_v7 = vmul.f32 %v66_v1, %v66_v1 }
  0x48   :  { %v116_v18 = vadd.f32 %v115_v14, %v52_v9  ;;  %v251_v20 = vadd.f32 %v250_v16, %v188_v11  ;;  %v68_v9 = vld [vmem:[%s523_s0 + $0x1a0] sm:$0xff]  ;;  %v204_v11 = vmul.f32 %v67_v5, %v67_v5 }
  0x4a   :  { %v117_v22 = vadd.f32 %v116_v18, %v53_v13  ;;  %v252_v24 = vadd.f32 %v251_v20, %v189_v15  ;;  %v69_v13 = vld [vmem:[%s523_s0 + $0x1a8] sm:$0xff]  ;;  %v205_v15 = vmul.f32 %v68_v9, %v68_v9 }
  0x4c   :  { %v118_v26 = vadd.f32 %v117_v22, %v54_v17  ;;  %v253_v28 = vadd.f32 %v252_v24, %v190_v19  ;;  %v70_v17 = vld [vmem:[%s523_s0 + $0x1b0] sm:$0xff]  ;;  %v206_v19 = vmul.f32 %v69_v13, %v69_v13 }
  0x4e   :  { %v119_v30 = vadd.f32 %v118_v26, %v55_v21  ;;  %v254_v32 = vadd.f32 %v253_v28, %v191_v23  ;;  %v71_v21 = vld [vmem:[%s523_s0 + $0x1b8] sm:$0xff]  ;;  %v207_v23 = vmul.f32 %v70_v17, %v70_v17 }
  0x50   :  { %v120_v34 = vadd.f32 %v119_v30, %v56_v25  ;;  %v255_v36 = vadd.f32 %v254_v32, %v192_v27  ;;  %v72_v25 = vld [vmem:[%s523_s0 + $0x1c0] sm:$0xff]  ;;  %v208_v27 = vmul.f32 %v71_v21, %v71_v21 }
  0x52   :  { %v121_v38 = vadd.f32 %v120_v34, %v57_v29  ;;  %v256_v40 = vadd.f32 %v255_v36, %v193_v31  ;;  %v73_v29 = vld [vmem:[%s523_s0 + $0x1c8] sm:$0xff]  ;;  %v209_v31 = vmul.f32 %v72_v25, %v72_v25 }
  0x54   :  { %v122_v42 = vadd.f32 %v121_v38, %v58_v33  ;;  %v257_v44 = vadd.f32 %v256_v40, %v194_v35  ;;  %v74_v33 = vld [vmem:[%s523_s0 + $0x1d0] sm:$0xff]  ;;  %v210_v35 = vmul.f32 %v73_v29, %v73_v29 }
  0x56   :  { %v123_v46 = vadd.f32 %v122_v42, %v59_v37  ;;  %v258_v48 = vadd.f32 %v257_v44, %v195_v39  ;;  %v75_v37 = vld [vmem:[%s523_s0 + $0x1d8] sm:$0xff]  ;;  %v211_v39 = vmul.f32 %v74_v33, %v74_v33 }
  0x58   :  { %v124_v50 = vadd.f32 %v123_v46, %v60_v41  ;;  %v259_v52 = vadd.f32 %v258_v48, %v196_v43  ;;  %v76_v41 = vld [vmem:[%s523_s0 + $0x1e0] sm:$0xff]  ;;  %v212_v43 = vmul.f32 %v75_v37, %v75_v37 }
  0x5a   :  { %v125_v54 = vadd.f32 %v124_v50, %v61_v45  ;;  %v260_v56 = vadd.f32 %v259_v52, %v197_v47  ;;  %v77_v45 = vld [vmem:[%s523_s0 + $0x1e8] sm:$0xff]  ;;  %v213_v47 = vmul.f32 %v76_v41, %v76_v41 }
  0x5c   :  { %v126_v58 = vadd.f32 %v125_v54, %v62_v49  ;;  %v261_v60 = vadd.f32 %v260_v56, %v198_v51  ;;  %v78_v49 = vld [vmem:[%s523_s0 + $0x1f0] sm:$0xff]  ;;  %v214_v51 = vmul.f32 %v77_v45, %v77_v45 }
  0x5e   :  { %v127_v62 = vadd.f32 %v126_v58, %v63_v53  ;;  %v262_v0 = vadd.f32 %v261_v60, %v199_v55  ;;  %v79_v53 = vld [vmem:[%s523_s0 + $0x1f8] sm:$0xff]  ;;  %v215_v55 = vmul.f32 %v78_v49, %v78_v49 }
  0x5f   :  { %v216_v58 = vmul.f32 %v79_v53, %v79_v53 }
  0x60   :  { %v128_v2 = vadd.f32 %v127_v62, %v64_v57  ;;  %v263_v4 = vadd.f32 %v262_v0, %v200_v59 }
  0x62   :  { %v129_v6 = vadd.f32 %v128_v2, %v65_v61  ;;  %v264_v8 = vadd.f32 %v263_v4, %v201_v63 }
  0x64   :  { %v130_v10 = vadd.f32 %v129_v6, %v66_v1  ;;  %v265_v12 = vadd.f32 %v264_v8, %v202_v3 }
  0x66   :  { %v131_v14 = vadd.f32 %v130_v10, %v67_v5  ;;  %v266_v16 = vadd.f32 %v265_v12, %v203_v7  ;;  %v80_v7 = vld [vmem:[%s524_s1] sm:$0x1] }
  0x67   :  { %v152_v12 = vld [vmem:[%s525_s2] sm:$0x1] }
  0x68   :  { %v132_v18 = vadd.f32 %v131_v14, %v68_v9  ;;  %v267_v20 = vadd.f32 %v266_v16, %v204_v11 }
  0x6a   :  { %v133_v22 = vadd.f32 %v132_v18, %v69_v13  ;;  %v268_v24 = vadd.f32 %v267_v20, %v205_v15 }
  0x6c   :  { %v134_v26 = vadd.f32 %v133_v22, %v70_v17  ;;  %v269_v28 = vadd.f32 %v268_v24, %v206_v19 }
  0x6e   :  { %v135_v30 = vadd.f32 %v134_v26, %v71_v21  ;;  %v270_v32 = vadd.f32 %v269_v28, %v207_v23 }
  0x70   :  { %v136_v34 = vadd.f32 %v135_v30, %v72_v25  ;;  %v271_v36 = vadd.f32 %v270_v32, %v208_v27 }
  0x72   :  { %v137_v38 = vadd.f32 %v136_v34, %v73_v29  ;;  %v272_v40 = vadd.f32 %v271_v36, %v209_v31 }
  0x74   :  { %v138_v42 = vadd.f32 %v137_v38, %v74_v33  ;;  %v273_v44 = vadd.f32 %v272_v40, %v210_v35 }
  0x76   :  { %v139_v46 = vadd.f32 %v138_v42, %v75_v37  ;;  %v274_v48 = vadd.f32 %v273_v44, %v211_v39 }
  0x78   :  { %v140_v50 = vadd.f32 %v139_v46, %v76_v41  ;;  %v275_v52 = vadd.f32 %v274_v48, %v212_v43 }
  0x7a   :  { %v141_v54 = vadd.f32 %v140_v50, %v77_v45  ;;  %v276_v56 = vadd.f32 %v275_v52, %v213_v47 }
  0x7c   :  { %v142_v57 = vadd.f32 %v141_v54, %v78_v49  ;;  %v277_v59 = vadd.f32 %v276_v56, %v214_v51 }
  0x7e   :  { %v143_v60 = vadd.f32 %v142_v57, %v79_v53  ;;  %v278_v61 = vadd.f32 %v277_v59, %v215_v55 }
  0x80   :  { %v144_v62 = vrot.slane %v143_v60, 4  ;;  %v279_v63 = vadd.f32 %v278_v61, %v216_v58 }
  0x82   :  { %v145_v0 = vadd.f32 %v144_v62, %v143_v60  ;;  %v280_v1 = vrot.slane %v279_v63, 4 }
  0x84   :  { %v146_v2 = vrot.slane %v145_v0, 2  ;;  %v281_v3 = vadd.f32 %v280_v1, %v279_v63 }
  0x86   :  { %v147_v4 = vadd.f32 %v146_v2, %v145_v0  ;;  %v282_v5 = vrot.slane %v281_v3, 2 }
  0x88   :  { %v148_v6 = vrot.slane %v147_v4, 1  ;;  %v283_v8 = vadd.f32 %v282_v5, %v281_v3 }
  0x8a   :  { %v149_v9 = vadd.f32 %v148_v6, %v147_v4  ;;  %v284_v10 = vrot.slane %v283_v8, 1 }
  0x8c   :  { %v150_v11 = vadd.f32 %v149_v9, %v80_v7  ;;  %v285_v13 = vadd.f32 %v284_v10, %v283_v8 }
  0x8e   :  { %151 = vst [vmem:[%s524_s1] sm:$0x1] %v150_v11  ;;  %v286_v14 = vadd.f32 %v285_v13, %v152_v12 }
  0x90   :  { %287 = vst [vmem:[%s525_s2] sm:$0x1] %v286_v14 }

// kernel: basic_block_forward.6
= control target key start
LH: loop header
LB: loop body
LE: loop exit
PB: predicated region body
PF: predicated region fallthrough
CT: control target
= control target key end

     0   :  { %s1375_s0 = inlined_call_operand.vmem [shape: f32[512,128], index: 0, kind: input, shape index: {}]   ;;  %s1376_s1 = inlined_call_operand.vmem [shape: f32[1,128], index: 1, kind: input, shape index: {}]   ;;  %s1377_s2 = inlined_call_operand.vmem [shape: f32[1,128], index: 2, kind: input, shape index: {}]   ;;  %s1378_s3 = inlined_call_operand.vmem [shape: bf16[512,128], index: 3, kind: output, shape index: {}]  }
   0x1   :  { %v14_v0 = vld [vmem:[%s1375_s0] sm:$0xff]  ;;  %v15_v1 = vld [vmem:[%s1375_s0 + $0x8] sm:$0xff]  ;;  %v16_v6 = vld [vmem:[%s1375_s0 + $0x10] sm:$0xff] }
   0x2   :  { %v958_v2 = vld [vmem:[%s1376_s1] ss:$0 sm:$0xff]  ;;  %v17_v7 = vld [vmem:[%s1375_s0 + $0x18] sm:$0xff]  ;;  %v19_v11 = vld [vmem:[%s1375_s0 + $0x28] sm:$0xff] }
   0x3   :  { %v85_v3 = vmul.f32 %v958_v2, %v14_v0  ;;  %v86_v4 = vmul.f32 %v958_v2, %v15_v1  ;;  %v965_v5 = vld [vmem:[%s1377_s2] ss:$0 sm:$0xff]  ;;  %v87_v8 = vmul.f32 %v958_v2, %v16_v6  ;;  %v88_v9 = vmul.f32 %v958_v2, %v17_v7  ;;  %v20_v12 = vld [vmem:[%s1375_s0 + $0x30] sm:$0xff]  ;;  %v21_v17 = vld [vmem:[%s1375_s0 + $0x38] sm:$0xff] }
   0x4   :  { %v18_v10 = vld [vmem:[%s1375_s0 + $0x20] sm:$0xff]  ;;  %v90_v16 = vmul.f32 %v958_v2, %v19_v11  ;;  %v91_v20 = vmul.f32 %v958_v2, %v20_v12  ;;  %v92_v21 = vmul.f32 %v958_v2, %v21_v17  ;;  %v23_v27 = vld [vmem:[%s1375_s0 + $0x48] sm:$0xff]  ;;  %v24_v32 = vld [vmem:[%s1375_s0 + $0x50] sm:$0xff] }
   0x5   :  { %v156_v13 = vadd.f32 %v965_v5, %v85_v3  ;;  %v157_v14 = vadd.f32 %v965_v5, %v86_v4  ;;  %v89_v15 = vmul.f32 %v958_v2, %v18_v10  ;;  %v158_v18 = vadd.f32 %v965_v5, %v87_v8  ;;  %v22_v22 = vld [vmem:[%s1375_s0 + $0x40] sm:$0xff]  ;;  %v25_v33 = vld [vmem:[%s1375_s0 + $0x58] sm:$0xff]  ;;  %v27_v39 = vld [vmem:[%s1375_s0 + $0x68] sm:$0xff] }
   0x6   :  { %v159_v19 = vadd.f32 %v965_v5, %v88_v9  ;;  %v161_v26 = vadd.f32 %v965_v5, %v90_v16  ;;  %v162_v30 = vadd.f32 %v965_v5, %v91_v20  ;;  %v163_v31 = vadd.f32 %v965_v5, %v92_v21  ;;  %v26_v38 = vld [vmem:[%s1375_s0 + $0x60] sm:$0xff]  ;;  %v28_v44 = vld [vmem:[%s1375_s0 + $0x70] sm:$0xff]  ;;  %v29_v49 = vld [vmem:[%s1375_s0 + $0x78] sm:$0xff] }
   0x7   :  { %v220_v23 = vmax.f32 %v156_v13, 0.0  ;;  %v221_v24 = vmax.f32 %v157_v14, 0.0  ;;  %v160_v25 = vadd.f32 %v965_v5, %v89_v15  ;;  %v222_v28 = vmax.f32 %v158_v18, 0.0  ;;  %v30_v54 = vld [vmem:[%s1375_s0 + $0x80] sm:$0xff]  ;;  %v31_v63 = vld [vmem:[%s1375_s0 + $0x88] sm:$0xff]  ;;  %v32_v6 = vld [vmem:[%s1375_s0 + $0x90] sm:$0xff] }
   0x8   :  { %v223_v29 = vmax.f32 %v159_v19, 0.0  ;;  %v225_v36 = vmax.f32 %v161_v26, 0.0  ;;  %v93_v37 = vmul.f32 %v958_v2, %v22_v22  ;;  %v226_v41 = vmax.f32 %v162_v30, 0.0  ;;  %v33_v7 = vld [vmem:[%s1375_s0 + $0x98] sm:$0xff]  ;;  %v34_v12 = vld [vmem:[%s1375_s0 + $0xa0] sm:$0xff]  ;;  %v35_v13 = vld [vmem:[%s1375_s0 + $0xa8] sm:$0xff] }
   0x9   :  { %v741_v34 = vpack.c.bf16 %v221_v24, %v220_v23  ;;  %v224_v35 = vmax.f32 %v160_v25, 0.0  ;;  %v227_v42 = vmax.f32 %v163_v31, 0.0  ;;  %v94_v43 = vmul.f32 %v958_v2, %v23_v27  ;;  %v36_v18 = vld [vmem:[%s1375_s0 + $0xb0] sm:$0xff]  ;;  %v37_v23 = vld [vmem:[%s1375_s0 + $0xb8] sm:$0xff] }
   0xa   :  { %v746_v40 = vpack.c.bf16 %v223_v29, %v222_v28  ;;  %v164_v46 = vadd.f32 %v965_v5, %v93_v37  ;;  %v95_v47 = vmul.f32 %v958_v2, %v24_v32  ;;  %v96_v48 = vmul.f32 %v958_v2, %v25_v33  ;;  %v38_v28 = vld [vmem:[%s1375_s0 + $0xc0] sm:$0xff]  ;;  %v39_v37 = vld [vmem:[%s1375_s0 + $0xc8] sm:$0xff] }
   0xb   :  { %742 = vst [vmem:[%s1378_s3] sm:$0xff] %v741_v34   ;;  %v751_v45 = vpack.c.bf16 %v225_v36, %v224_v35  ;;  %v756_v50 = vpack.c.bf16 %v227_v42, %v226_v41  ;;  %v165_v51 = vadd.f32 %v965_v5, %v94_v43  ;;  %v97_v52 = vmul.f32 %v958_v2, %v26_v38  ;;  %v40_v42 = vld [vmem:[%s1375_s0 + $0xd0] sm:$0xff]  ;;  %v41_v43 = vld [vmem:[%s1375_s0 + $0xd8] sm:$0xff] }
   0xc   :  { %898 = vst [vmem:[%s1378_s3 + $0x8] sm:$0xff] %v746_v40   ;;  %v98_v53 = vmul.f32 %v958_v2, %v27_v39  ;;  %v228_v55 = vmax.f32 %v164_v46, 0.0  ;;  %v166_v56 = vadd.f32 %v965_v5, %v95_v47  ;;  %v167_v57 = vadd.f32 %v965_v5, %v96_v48  ;;  %v42_v48 = vld [vmem:[%s1375_s0 + $0xe0] sm:$0xff] }
   0xd   :  { %899 = vst [vmem:[%s1378_s3 + $0x10] sm:$0xff] %v751_v45   ;;  %v99_v58 = vmul.f32 %v958_v2, %v28_v44  ;;  %900 = vst [vmem:[%s1378_s3 + $0x18] sm:$0xff] %v756_v50   ;;  %v229_v59 = vmax.f32 %v165_v51, 0.0  ;;  %v168_v60 = vadd.f32 %v965_v5, %v97_v52  ;;  %v100_v62 = vmul.f32 %v958_v2, %v29_v49  ;;  %v43_v49 = vld [vmem:[%s1375_s0 + $0xe8] sm:$0xff] }
   0xe   :  { %v169_v61 = vadd.f32 %v965_v5, %v98_v53  ;;  %v230_v0 = vmax.f32 %v166_v56, 0.0  ;;  %v231_v1 = vmax.f32 %v167_v57, 0.0  ;;  %v101_v4 = vmul.f32 %v958_v2, %v30_v54  ;;  %v44_v54 = vld [vmem:[%s1375_s0 + $0xf0] sm:$0xff] }
   0xf   :  { %v170_v3 = vadd.f32 %v965_v5, %v99_v58  ;;  %v761_v8 = vpack.c.bf16 %v229_v59, %v228_v55  ;;  %v232_v9 = vmax.f32 %v168_v60, 0.0  ;;  %v171_v11 = vadd.f32 %v965_v5, %v100_v62  ;;  %v45_v59 = vld [vmem:[%s1375_s0 + $0xf8] sm:$0xff] }
  0x10   :  { %v233_v10 = vmax.f32 %v169_v61, 0.0  ;;  %v766_v14 = vpack.c.bf16 %v231_v1, %v230_v0  ;;  %v102_v16 = vmul.f32 %v958_v2, %v31_v63  ;;  %v172_v17 = vadd.f32 %v965_v5, %v101_v4  ;;  %v46_v0 = vld [vmem:[%s1375_s0 + $0x100] sm:$0xff] }
  0x11   :  { %v234_v15 = vmax.f32 %v170_v3, 0.0  ;;  %901 = vst [vmem:[%s1378_s3 + $0x20] sm:$0xff] %v761_v8   ;;  %v235_v20 = vmax.f32 %v171_v11, 0.0  ;;  %v103_v21 = vmul.f32 %v958_v2, %v32_v6  ;;  %v104_v22 = vmul.f32 %v958_v2, %v33_v7  ;;  %v47_v11 = vld [vmem:[%s1375_s0 + $0x108] sm:$0xff] }
  0x12   :  { %v771_v19 = vpack.c.bf16 %v233_v10, %v232_v9  ;;  %902 = vst [vmem:[%s1378_s3 + $0x28] sm:$0xff] %v766_v14   ;;  %v173_v24 = vadd.f32 %v965_v5, %v102_v16  ;;  %v236_v25 = vmax.f32 %v172_v17, 0.0  ;;  %v105_v26 = vmul.f32 %v958_v2, %v34_v12  ;;  %v48_v16 = vld [vmem:[%s1375_s0 + $0x110] sm:$0xff]  ;;  %v49_v17 = vld [vmem:[%s1375_s0 + $0x118] sm:$0xff] }
  0x13   :  { %v106_v27 = vmul.f32 %v958_v2, %v35_v13  ;;  %v776_v29 = vpack.c.bf16 %v235_v20, %v234_v15  ;;  %v174_v30 = vadd.f32 %v965_v5, %v103_v21  ;;  %v175_v31 = vadd.f32 %v965_v5, %v104_v22  ;;  %v50_v22 = vld [vmem:[%s1375_s0 + $0x120] sm:$0xff] }
  0x14   :  { %903 = vst [vmem:[%s1378_s3 + $0x30] sm:$0xff] %v771_v19   ;;  %v107_v32 = vmul.f32 %v958_v2, %v36_v18  ;;  %v237_v33 = vmax.f32 %v173_v24, 0.0  ;;  %v176_v34 = vadd.f32 %v965_v5, %v105_v26  ;;  %v108_v36 = vmul.f32 %v958_v2, %v37_v23  ;;  %v51_v23 = vld [vmem:[%s1375_s0 + $0x128] sm:$0xff] }
  0x15   :  { %v177_v35 = vadd.f32 %v965_v5, %v106_v27  ;;  %904 = vst [vmem:[%s1378_s3 + $0x38] sm:$0xff] %v776_v29   ;;  %v238_v38 = vmax.f32 %v174_v30, 0.0  ;;  %v239_v39 = vmax.f32 %v175_v31, 0.0  ;;  %v109_v41 = vmul.f32 %v958_v2, %v38_v28  ;;  %v52_v28 = vld [vmem:[%s1375_s0 + $0x130] sm:$0xff] }
  0x16   :  { %v178_v40 = vadd.f32 %v965_v5, %v107_v32  ;;  %v781_v44 = vpack.c.bf16 %v237_v33, %v236_v25  ;;  %v240_v45 = vmax.f32 %v176_v34, 0.0  ;;  %v179_v47 = vadd.f32 %v965_v5, %v108_v36  ;;  %v53_v33 = vld [vmem:[%s1375_s0 + $0x138] sm:$0xff] }
  0x17   :  { %v241_v46 = vmax.f32 %v177_v35, 0.0  ;;  %v786_v50 = vpack.c.bf16 %v239_v39, %v238_v38  ;;  %v110_v52 = vmul.f32 %v958_v2, %v39_v37  ;;  %v180_v53 = vadd.f32 %v965_v5, %v109_v41  ;;  %v54_v38 = vld [vmem:[%s1375_s0 + $0x140] sm:$0xff] }
  0x18   :  { %v242_v51 = vmax.f32 %v178_v40, 0.0  ;;  %905 = vst [vmem:[%s1378_s3 + $0x40] sm:$0xff] %v781_v44   ;;  %v243_v56 = vmax.f32 %v179_v47, 0.0  ;;  %v111_v57 = vmul.f32 %v958_v2, %v40_v42  ;;  %v112_v58 = vmul.f32 %v958_v2, %v41_v43  ;;  %v55_v47 = vld [vmem:[%s1375_s0 + $0x148] sm:$0xff] }
  0x19   :  { %v791_v55 = vpack.c.bf16 %v241_v46, %v240_v45  ;;  %906 = vst [vmem:[%s1378_s3 + $0x48] sm:$0xff] %v786_v50   ;;  %v181_v60 = vadd.f32 %v965_v5, %v110_v52  ;;  %v244_v61 = vmax.f32 %v180_v53, 0.0  ;;  %v113_v62 = vmul.f32 %v958_v2, %v42_v48  ;;  %v56_v52 = vld [vmem:[%s1375_s0 + $0x150] sm:$0xff]  ;;  %v57_v53 = vld [vmem:[%s1375_s0 + $0x158] sm:$0xff] }
  0x1a   :  { %v114_v63 = vmul.f32 %v958_v2, %v43_v49  ;;  %v796_v1 = vpack.c.bf16 %v243_v56, %v242_v51  ;;  %v182_v3 = vadd.f32 %v965_v5, %v111_v57  ;;  %v183_v4 = vadd.f32 %v965_v5, %v112_v58  ;;  %v58_v58 = vld [vmem:[%s1375_s0 + $0x160] sm:$0xff] }
  0x1b   :  { %907 = vst [vmem:[%s1378_s3 + $0x50] sm:$0xff] %v791_v55   ;;  %v115_v6 = vmul.f32 %v958_v2, %v44_v54  ;;  %v245_v7 = vmax.f32 %v181_v60, 0.0  ;;  %v184_v8 = vadd.f32 %v965_v5, %v113_v62  ;;  %v116_v10 = vmul.f32 %v958_v2, %v45_v59  ;;  %v59_v59 = vld [vmem:[%s1375_s0 + $0x168] sm:$0xff] }
  0x1c   :  { %v185_v9 = vadd.f32 %v965_v5, %v114_v63  ;;  %908 = vst [vmem:[%s1378_s3 + $0x58] sm:$0xff] %v796_v1   ;;  %v246_v12 = vmax.f32 %v182_v3, 0.0  ;;  %v247_v13 = vmax.f32 %v183_v4, 0.0  ;;  %v117_v15 = vmul.f32 %v958_v2, %v46_v0  ;;  %v60_v0 = vld [vmem:[%s1375_s0 + $0x170] sm:$0xff] }
  0x1d   :  { %v186_v14 = vadd.f32 %v965_v5, %v115_v6  ;;  %v801_v18 = vpack.c.bf16 %v245_v7, %v244_v61  ;;  %v248_v19 = vmax.f32 %v184_v8, 0.0  ;;  %v187_v21 = vadd.f32 %v965_v5, %v116_v10  ;;  %v61_v7 = vld [vmem:[%s1375_s0 + $0x178] sm:$0xff] }
  0x1e   :  { %v249_v20 = vmax.f32 %v185_v9, 0.0  ;;  %v806_v24 = vpack.c.bf16 %v247_v13, %v246_v12  ;;  %v118_v26 = vmul.f32 %v958_v2, %v47_v11  ;;  %v188_v27 = vadd.f32 %v965_v5, %v117_v15  ;;  %v62_v12 = vld [vmem:[%s1375_s0 + $0x180] sm:$0xff] }
  0x1f   :  { %v250_v25 = vmax.f32 %v186_v14, 0.0  ;;  %909 = vst [vmem:[%s1378_s3 + $0x60] sm:$0xff] %v801_v18   ;;  %v251_v30 = vmax.f32 %v187_v21, 0.0  ;;  %v119_v31 = vmul.f32 %v958_v2, %v48_v16  ;;  %v120_v32 = vmul.f32 %v958_v2, %v49_v17  ;;  %v63_v21 = vld [vmem:[%s1375_s0 + $0x188] sm:$0xff] }
  0x20   :  { %v811_v29 = vpack.c.bf16 %v249_v20, %v248_v19  ;;  %910 = vst [vmem:[%s1378_s3 + $0x68] sm:$0xff] %v806_v24   ;;  %v189_v34 = vadd.f32 %v965_v5, %v118_v26  ;;  %v252_v35 = vmax.f32 %v188_v27, 0.0  ;;  %v121_v36 = vmul.f32 %v958_v2, %v50_v22  ;;  %v64_v26 = vld [vmem:[%s1375_s0 + $0x190] sm:$0xff]  ;;  %v65_v27 = vld [vmem:[%s1375_s0 + $0x198] sm:$0xff] }
  0x21   :  { %v122_v37 = vmul.f32 %v958_v2, %v51_v23  ;;  %v816_v39 = vpack.c.bf16 %v251_v30, %v250_v25  ;;  %v190_v40 = vadd.f32 %v965_v5, %v119_v31  ;;  %v191_v41 = vadd.f32 %v965_v5, %v120_v32  ;;  %v66_v32 = vld [vmem:[%s1375_s0 + $0x1a0] sm:$0xff] }
  0x22   :  { %911 = vst [vmem:[%s1378_s3 + $0x70] sm:$0xff] %v811_v29   ;;  %v123_v42 = vmul.f32 %v958_v2, %v52_v28  ;;  %v253_v43 = vmax.f32 %v189_v34, 0.0  ;;  %v192_v44 = vadd.f32 %v965_v5, %v121_v36  ;;  %v124_v46 = vmul.f32 %v958_v2, %v53_v33  ;;  %v67_v33 = vld [vmem:[%s1375_s0 + $0x1a8] sm:$0xff] }
  0x23   :  { %v193_v45 = vadd.f32 %v965_v5, %v122_v37  ;;  %912 = vst [vmem:[%s1378_s3 + $0x78] sm:$0xff] %v816_v39   ;;  %v254_v48 = vmax.f32 %v190_v40, 0.0  ;;  %v255_v49 = vmax.f32 %v191_v41, 0.0  ;;  %v125_v51 = vmul.f32 %v958_v2, %v54_v38  ;;  %v68_v38 = vld [vmem:[%s1375_s0 + $0x1b0] sm:$0xff] }
  0x24   :  { %v194_v50 = vadd.f32 %v965_v5, %v123_v42  ;;  %v821_v54 = vpack.c.bf16 %v253_v43, %v252_v35  ;;  %v256_v55 = vmax.f32 %v192_v44, 0.0  ;;  %v195_v57 = vadd.f32 %v965_v5, %v124_v46  ;;  %v69_v43 = vld [vmem:[%s1375_s0 + $0x1b8] sm:$0xff] }
  0x25   :  { %v257_v56 = vmax.f32 %v193_v45, 0.0  ;;  %v826_v60 = vpack.c.bf16 %v255_v49, %v254_v48  ;;  %v126_v62 = vmul.f32 %v958_v2, %v55_v47  ;;  %v196_v63 = vadd.f32 %v965_v5, %v125_v51  ;;  %v70_v48 = vld [vmem:[%s1375_s0 + $0x1c0] sm:$0xff] }
  0x26   :  { %v258_v61 = vmax.f32 %v194_v50, 0.0  ;;  %913 = vst [vmem:[%s1378_s3 + $0x80] sm:$0xff] %v821_v54   ;;  %v259_v3 = vmax.f32 %v195_v57, 0.0  ;;  %v127_v4 = vmul.f32 %v958_v2, %v56_v52  ;;  %v128_v6 = vmul.f32 %v958_v2, %v57_v53  ;;  %v71_v57 = vld [vmem:[%s1375_s0 + $0x1c8] sm:$0xff] }
  0x27   :  { %v831_v1 = vpack.c.bf16 %v257_v56, %v256_v55  ;;  %914 = vst [vmem:[%s1378_s3 + $0x88] sm:$0xff] %v826_v60   ;;  %v197_v8 = vadd.f32 %v965_v5, %v126_v62  ;;  %v260_v9 = vmax.f32 %v196_v63, 0.0  ;;  %v129_v10 = vmul.f32 %v958_v2, %v58_v58  ;;  %v72_v62 = vld [vmem:[%s1375_s0 + $0x1d0] sm:$0xff]  ;;  %v73_v63 = vld [vmem:[%s1375_s0 + $0x1d8] sm:$0xff] }
  0x28   :  { %v130_v11 = vmul.f32 %v958_v2, %v59_v59  ;;  %v836_v13 = vpack.c.bf16 %v259_v3, %v258_v61  ;;  %v198_v14 = vadd.f32 %v965_v5, %v127_v4  ;;  %v199_v15 = vadd.f32 %v965_v5, %v128_v6  ;;  %v74_v6 = vld [vmem:[%s1375_s0 + $0x1e0] sm:$0xff] }
  0x29   :  { %915 = vst [vmem:[%s1378_s3 + $0x90] sm:$0xff] %v831_v1   ;;  %v131_v16 = vmul.f32 %v958_v2, %v60_v0  ;;  %v261_v17 = vmax.f32 %v197_v8, 0.0  ;;  %v200_v18 = vadd.f32 %v965_v5, %v129_v10  ;;  %v132_v20 = vmul.f32 %v958_v2, %v61_v7  ;;  %v75_v7 = vld [vmem:[%s1375_s0 + $0x1e8] sm:$0xff] }
  0x2a   :  { %v201_v19 = vadd.f32 %v965_v5, %v130_v11  ;;  %916 = vst [vmem:[%s1378_s3 + $0x98] sm:$0xff] %v836_v13   ;;  %v262_v22 = vmax.f32 %v198_v14, 0.0  ;;  %v263_v23 = vmax.f32 %v199_v15, 0.0  ;;  %v133_v25 = vmul.f32 %v958_v2, %v62_v12  ;;  %v76_v12 = vld [vmem:[%s1375_s0 + $0x1f0] sm:$0xff] }
  0x2b   :  { %v202_v24 = vadd.f32 %v965_v5, %v131_v16  ;;  %v841_v28 = vpack.c.bf16 %v261_v17, %v260_v9  ;;  %v264_v29 = vmax.f32 %v200_v18, 0.0  ;;  %v203_v31 = vadd.f32 %v965_v5, %v132_v20  ;;  %v77_v17 = vld [vmem:[%s1375_s0 + $0x1f8] sm:$0xff] }
  0x2c   :  { %v265_v30 = vmax.f32 %v201_v19, 0.0  ;;  %v846_v34 = vpack.c.bf16 %v263_v23, %v262_v22  ;;  %v134_v36 = vmul.f32 %v958_v2, %v63_v21  ;;  %v204_v37 = vadd.f32 %v965_v5, %v133_v25 }
  0x2d   :  { %v266_v35 = vmax.f32 %v202_v24, 0.0  ;;  %917 = vst [vmem:[%s1378_s3 + $0xa0] sm:$0xff] %v841_v28   ;;  %v267_v40 = vmax.f32 %v203_v31, 0.0  ;;  %v135_v41 = vmul.f32 %v958_v2, %v64_v26  ;;  %v136_v42 = vmul.f32 %v958_v2, %v65_v27 }
  0x2e   :  { %v851_v39 = vpack.c.bf16 %v265_v30, %v264_v29  ;;  %918 = vst [vmem:[%s1378_s3 + $0xa8] sm:$0xff] %v846_v34   ;;  %v205_v44 = vadd.f32 %v965_v5, %v134_v36  ;;  %v268_v45 = vmax.f32 %v204_v37, 0.0  ;;  %v137_v46 = vmul.f32 %v958_v2, %v66_v32 }
  0x2f   :  { %v138_v47 = vmul.f32 %v958_v2, %v67_v33  ;;  %v856_v49 = vpack.c.bf16 %v267_v40, %v266_v35  ;;  %v206_v50 = vadd.f32 %v965_v5, %v135_v41  ;;  %v207_v51 = vadd.f32 %v965_v5, %v136_v42 }
  0x30   :  { %919 = vst [vmem:[%s1378_s3 + $0xb0] sm:$0xff] %v851_v39   ;;  %v139_v52 = vmul.f32 %v958_v2, %v68_v38  ;;  %v269_v53 = vmax.f32 %v205_v44, 0.0  ;;  %v208_v54 = vadd.f32 %v965_v5, %v137_v46  ;;  %v140_v56 = vmul.f32 %v958_v2, %v69_v43 }
  0x31   :  { %v209_v55 = vadd.f32 %v965_v5, %v138_v47  ;;  %920 = vst [vmem:[%s1378_s3 + $0xb8] sm:$0xff] %v856_v49   ;;  %v270_v58 = vmax.f32 %v206_v50, 0.0  ;;  %v271_v59 = vmax.f32 %v207_v51, 0.0  ;;  %v141_v61 = vmul.f32 %v958_v2, %v70_v48 }
  0x32   :  { %v210_v60 = vadd.f32 %v965_v5, %v139_v52  ;;  %v861_v0 = vpack.c.bf16 %v269_v53, %v268_v45  ;;  %v272_v1 = vmax.f32 %v208_v54, 0.0  ;;  %v211_v4 = vadd.f32 %v965_v5, %v140_v56 }
  0x33   :  { %v273_v3 = vmax.f32 %v209_v55, 0.0  ;;  %v866_v8 = vpack.c.bf16 %v271_v59, %v270_v58  ;;  %v142_v10 = vmul.f32 %v958_v2, %v71_v57  ;;  %v212_v11 = vadd.f32 %v965_v5, %v141_v61 }
  0x34   :  { %v274_v9 = vmax.f32 %v210_v60, 0.0  ;;  %921 = vst [vmem:[%s1378_s3 + $0xc0] sm:$0xff] %v861_v0   ;;  %v275_v14 = vmax.f32 %v211_v4, 0.0  ;;  %v143_v15 = vmul.f32 %v958_v2, %v72_v62  ;;  %v144_v16 = vmul.f32 %v958_v2, %v73_v63 }
  0x35   :  { %v871_v13 = vpack.c.bf16 %v273_v3, %v272_v1  ;;  %922 = vst [vmem:[%s1378_s3 + $0xc8] sm:$0xff] %v866_v8   ;;  %v213_v18 = vadd.f32 %v965_v5, %v142_v10  ;;  %v276_v19 = vmax.f32 %v212_v11, 0.0  ;;  %v145_v20 = vmul.f32 %v958_v2, %v74_v6 }
  0x36   :  { %v146_v21 = vmul.f32 %v958_v2, %v75_v7  ;;  %v876_v22 = vpack.c.bf16 %v275_v14, %v274_v9  ;;  %v214_v23 = vadd.f32 %v965_v5, %v143_v15  ;;  %v215_v24 = vadd.f32 %v965_v5, %v144_v16 }
  0x37   :  { %923 = vst [vmem:[%s1378_s3 + $0xd0] sm:$0xff] %v871_v13   ;;  %v147_v25 = vmul.f32 %v958_v2, %v76_v12  ;;  %v277_v26 = vmax.f32 %v213_v18, 0.0  ;;  %v216_v27 = vadd.f32 %v965_v5, %v145_v20  ;;  %v148_v29 = vmul.f32 %v958_v2, %v77_v17 }
  0x38   :  { %v217_v28 = vadd.f32 %v965_v5, %v146_v21  ;;  %924 = vst [vmem:[%s1378_s3 + $0xd8] sm:$0xff] %v876_v22   ;;  %v278_v30 = vmax.f32 %v214_v23, 0.0  ;;  %v279_v31 = vmax.f32 %v215_v24, 0.0 }
  0x39   :  { %v218_v32 = vadd.f32 %v965_v5, %v147_v25  ;;  %v881_v33 = vpack.c.bf16 %v277_v26, %v276_v19  ;;  %v280_v34 = vmax.f32 %v216_v27, 0.0  ;;  %v219_v36 = vadd.f32 %v965_v5, %v148_v29 }
  0x3a   :  { %v281_v35 = vmax.f32 %v217_v28, 0.0  ;;  %v886_v37 = vpack.c.bf16 %v279_v31, %v278_v30 }
  0x3b   :  { %v282_v38 = vmax.f32 %v218_v32, 0.0  ;;  %925 = vst [vmem:[%s1378_s3 + $0xe0] sm:$0xff] %v881_v33   ;;  %v283_v39 = vmax.f32 %v219_v36, 0.0 }
  0x3c   :  { %v891_v2 = vpack.c.bf16 %v281_v35, %v280_v34  ;;  %926 = vst [vmem:[%s1378_s3 + $0xe8] sm:$0xff] %v886_v37  }
  0x3d   :  { %v896_v40 = vpack.c.bf16 %v283_v39, %v282_v38 }
  0x3e   :  { %927 = vst [vmem:[%s1378_s3 + $0xf0] sm:$0xff] %v891_v2  }
  0x3f   :  { %928 = vst [vmem:[%s1378_s3 + $0xf8] sm:$0xff] %v896_v40  }

// kernel: basic_block_forward.8
= control target key start
LH: loop header
LB: loop body
LE: loop exit
PB: predicated region body
PF: predicated region fallthrough
CT: control target
= control target key end

     0   :  { %s391_s0 = inlined_call_operand.vmem [shape: f32[128,128], index: 0, kind: input, shape index: {}]   ;;  %s392_s1 = inlined_call_operand.vmem [shape: f32[1,128], index: 1, kind: input, shape index: {}]   ;;  %s393_s2 = inlined_call_operand.vmem [shape: f32[1,128], index: 2, kind: input, shape index: {}]   ;;  %s394_s3 = inlined_call_operand.vmem [shape: bf16[128,128], index: 3, kind: output, shape index: {}]  }
   0x1   :  { %v14_v0 = vld [vmem:[%s391_s0] sm:$0xff]  ;;  %v15_v1 = vld [vmem:[%s391_s0 + $0x8] sm:$0xff]  ;;  %v16_v6 = vld [vmem:[%s391_s0 + $0x10] sm:$0xff] }
   0x2   :  { %v286_v2 = vld [vmem:[%s392_s1] ss:$0 sm:$0xff]  ;;  %v17_v7 = vld [vmem:[%s391_s0 + $0x18] sm:$0xff]  ;;  %v19_v11 = vld [vmem:[%s391_s0 + $0x28] sm:$0xff] }
   0x3   :  { %v37_v3 = vmul.f32 %v286_v2, %v14_v0  ;;  %v38_v4 = vmul.f32 %v286_v2, %v15_v1  ;;  %v293_v5 = vld [vmem:[%s393_s2] ss:$0 sm:$0xff]  ;;  %v39_v8 = vmul.f32 %v286_v2, %v16_v6  ;;  %v40_v9 = vmul.f32 %v286_v2, %v17_v7  ;;  %v20_v12 = vld [vmem:[%s391_s0 + $0x30] sm:$0xff]  ;;  %v21_v17 = vld [vmem:[%s391_s0 + $0x38] sm:$0xff] }
   0x4   :  { %v18_v10 = vld [vmem:[%s391_s0 + $0x20] sm:$0xff]  ;;  %v42_v16 = vmul.f32 %v286_v2, %v19_v11  ;;  %v43_v20 = vmul.f32 %v286_v2, %v20_v12  ;;  %v44_v21 = vmul.f32 %v286_v2, %v21_v17  ;;  %v23_v27 = vld [vmem:[%s391_s0 + $0x48] sm:$0xff]  ;;  %v24_v32 = vld [vmem:[%s391_s0 + $0x50] sm:$0xff] }
   0x5   :  { %v60_v13 = vadd.f32 %v293_v5, %v37_v3  ;;  %v61_v14 = vadd.f32 %v293_v5, %v38_v4  ;;  %v41_v15 = vmul.f32 %v286_v2, %v18_v10  ;;  %v62_v18 = vadd.f32 %v293_v5, %v39_v8  ;;  %v22_v22 = vld [vmem:[%s391_s0 + $0x40] sm:$0xff]  ;;  %v25_v33 = vld [vmem:[%s391_s0 + $0x58] sm:$0xff]  ;;  %v27_v39 = vld [vmem:[%s391_s0 + $0x68] sm:$0xff] }
   0x6   :  { %v63_v19 = vadd.f32 %v293_v5, %v40_v9  ;;  %v65_v26 = vadd.f32 %v293_v5, %v42_v16  ;;  %v66_v30 = vadd.f32 %v293_v5, %v43_v20  ;;  %v67_v31 = vadd.f32 %v293_v5, %v44_v21  ;;  %v26_v38 = vld [vmem:[%s391_s0 + $0x60] sm:$0xff]  ;;  %v28_v44 = vld [vmem:[%s391_s0 + $0x70] sm:$0xff]  ;;  %v29_v49 = vld [vmem:[%s391_s0 + $0x78] sm:$0xff] }
   0x7   :  { %v76_v23 = vmax.f32 %v60_v13, 0.0  ;;  %v77_v24 = vmax.f32 %v61_v14, 0.0  ;;  %v64_v25 = vadd.f32 %v293_v5, %v41_v15  ;;  %v78_v28 = vmax.f32 %v62_v18, 0.0 }
   0x8   :  { %v79_v29 = vmax.f32 %v63_v19, 0.0  ;;  %v81_v36 = vmax.f32 %v65_v26, 0.0  ;;  %v45_v37 = vmul.f32 %v286_v2, %v22_v22  ;;  %v82_v41 = vmax.f32 %v66_v30, 0.0 }
   0x9   :  { %v213_v34 = vpack.c.bf16 %v77_v24, %v76_v23  ;;  %v80_v35 = vmax.f32 %v64_v25, 0.0  ;;  %v83_v42 = vmax.f32 %v67_v31, 0.0  ;;  %v46_v43 = vmul.f32 %v286_v2, %v23_v27 }
   0xa   :  { %v218_v40 = vpack.c.bf16 %v79_v29, %v78_v28  ;;  %v68_v46 = vadd.f32 %v293_v5, %v45_v37  ;;  %v47_v47 = vmul.f32 %v286_v2, %v24_v32  ;;  %v48_v48 = vmul.f32 %v286_v2, %v25_v33 }
   0xb   :  { %214 = vst [vmem:[%s394_s3] sm:$0xff] %v213_v34   ;;  %v223_v45 = vpack.c.bf16 %v81_v36, %v80_v35  ;;  %v228_v50 = vpack.c.bf16 %v83_v42, %v82_v41  ;;  %v69_v51 = vadd.f32 %v293_v5, %v46_v43  ;;  %v49_v52 = vmul.f32 %v286_v2, %v26_v38 }
   0xc   :  { %250 = vst [vmem:[%s394_s3 + $0x8] sm:$0xff] %v218_v40   ;;  %v50_v53 = vmul.f32 %v286_v2, %v27_v39  ;;  %v84_v54 = vmax.f32 %v68_v46, 0.0  ;;  %v70_v55 = vadd.f32 %v293_v5, %v47_v47  ;;  %v71_v56 = vadd.f32 %v293_v5, %v48_v48 }
   0xd   :  { %251 = vst [vmem:[%s394_s3 + $0x10] sm:$0xff] %v223_v45   ;;  %v51_v57 = vmul.f32 %v286_v2, %v28_v44  ;;  %252 = vst [vmem:[%s394_s3 + $0x18] sm:$0xff] %v228_v50   ;;  %v85_v58 = vmax.f32 %v69_v51, 0.0  ;;  %v72_v59 = vadd.f32 %v293_v5, %v49_v52  ;;  %v52_v61 = vmul.f32 %v286_v2, %v29_v49 }
   0xe   :  { %v73_v60 = vadd.f32 %v293_v5, %v50_v53  ;;  %v86_v62 = vmax.f32 %v70_v55, 0.0  ;;  %v87_v63 = vmax.f32 %v71_v56, 0.0 }
   0xf   :  { %v74_v0 = vadd.f32 %v293_v5, %v51_v57  ;;  %v233_v1 = vpack.c.bf16 %v85_v58, %v84_v54  ;;  %v88_v3 = vmax.f32 %v72_v59, 0.0  ;;  %v75_v6 = vadd.f32 %v293_v5, %v52_v61 }
  0x10   :  { %v89_v4 = vmax.f32 %v73_v60, 0.0  ;;  %v238_v7 = vpack.c.bf16 %v87_v63, %v86_v62 }
  0x11   :  { %v90_v8 = vmax.f32 %v74_v0, 0.0  ;;  %253 = vst [vmem:[%s394_s3 + $0x20] sm:$0xff] %v233_v1   ;;  %v91_v10 = vmax.f32 %v75_v6, 0.0 }
  0x12   :  { %v243_v9 = vpack.c.bf16 %v89_v4, %v88_v3  ;;  %254 = vst [vmem:[%s394_s3 + $0x28] sm:$0xff] %v238_v7  }
  0x13   :  { %v248_v2 = vpack.c.bf16 %v91_v10, %v90_v8 }
  0x14   :  { %255 = vst [vmem:[%s394_s3 + $0x30] sm:$0xff] %v243_v9  }
  0x15   :  { %256 = vst [vmem:[%s394_s3 + $0x38] sm:$0xff] %v248_v2  }

// kernel: basic_block_forward.7
= control target key start
LH: loop header
LB: loop body
LE: loop exit
PB: predicated region body
PF: predicated region fallthrough
CT: control target
= control target key end

     0   :  { %s1640_s15 = smov 0   ;;  %s1642_s16 = smov 0   ;;  %s1881_s0 = inlined_call_operand.vmem [shape: bf16[128,1152], index: 0, kind: input, shape index: {}]   ;;  %s1882_s1 = inlined_call_operand.vmem [shape: bf16[1152,128], index: 1, kind: input, shape index: {}]   ;;  %s1883_s2 = inlined_call_operand.vmem [shape: f32[128,128], index: 2, kind: output, shape index: {0}]   ;;  %s1884_s3 = inlined_call_operand.vmem [shape: f32[1,1,128], index: 3, kind: output, shape index: {1}]   ;;  %s1885_s4 = inlined_call_operand.vmem [shape: f32[1,1,128], index: 4, kind: output, shape index: {2}]  }
   0x1   :  { %s1644_s17 = smov 0   ;;  %s1646_s18 = smov 0  }
   0x2   :  { %s1648_s19 = smov 0  }
   0x3 LB: > { %s27_s20 = sadd.s32 1, %s1608_s18  ;;  %p50_p1 = scmp.ne.s32.totalorder %s1600_s16, %s1596_s15  ;;  %s1612_s19 = sphi %s1648_s19, %s15_s19   ;;  %s1608_s18 = sphi %s1646_s18, %s1889_s18   ;;  %s1604_s17 = sphi %s1644_s17, %s1888_s17   ;;  %s1600_s16 = sphi %s1642_s16, %s1887_s16   ;;  %s1596_s15 = sphi %s1640_s15, %s1886_s15  }
   0x4   : > { %p28_p0 = scmp.ge.s32.totalorder %s27_s20, 3  ;;  %p51_p2 = scmp.eq.s32.totalorder %s1612_s19, 0 }
   0x5   : > { %s43_s22 = sadd.s32 1, %s1600_s16  ;;  %p1270_p5 = scmp.ge.s32.totalorder %s1612_s19, 3 }
   0x6   : > { %s1891_s20 = smov (%p28_p0, %s27_s20), 0  ;;  %p52_p3 = por %p51_p2, %p50_p1 }
   0x7   : > { %s39_s21 = ssub.s32 %s1608_s18, %s1891_s20  ;;  %188 = sbr.rel (%p1270_p5) target bundleno = 37 (0x25), region = 16 }
   0x8   : > { %p41_p4 = scmp.eq.s32.totalorder %s39_s21, 0 }
   0xa   : > { %s1675_s23 = scalar_select %p41_p4, %s1600_s16, %s43_s22  }
   0xe   : > { %191 = sbr.rel (!%p52_p3) target bundleno = 37 (0x25), region = 20  ;;  %s193_s24 = sand.u32 (%p52_p3), 1, %s1600_s16  }
   0xf   : > { %s1362_s25 = smul.u32 (%p52_p3), 12, %s1608_s18 }
  0x10   : > { %s1475_s26 = smul.u32 (%p52_p3), 192, %s193_s24 }
  0x11   : > { %s1683_s29 = scalar_lea.vmem (%p52_p3), %s1881_s0, %s1362_s25 }
  0x12   : > { %v216_v0 = vld [vmem:[%s1683_s29] sm:$0xff] (%p52_p3)  ;;  %v220_v2 = vld [vmem:[%s1683_s29 + $0x48] sm:$0xff] (%p52_p3)  ;;  %s1688_s30 = scalar_lea.vmem (%p52_p3), [#allocation3], %s1475_s26  ;;  %v224_v4 = vld [vmem:[%s1683_s29 + $0x90] sm:$0xff] (%p52_p3) }
  0x13   : > { %v218_v1 = vld [vmem:[%s1683_s29 + $0x24] sm:$0xff] (%p52_p3)  ;;  %217 = vst [vmem:[%s1688_s30] sm:$0xff] (%p52_p3), %v216_v0  ;;  %221 = vst [vmem:[%s1688_s30 + $0x18] sm:$0xff] (%p52_p3), %v220_v2  ;;  %v222_v3 = vld [vmem:[%s1683_s29 + $0x6c] sm:$0xff] (%p52_p3) }
  0x14   : > { %219 = vst [vmem:[%s1688_s30 + $0xc] sm:$0xff] (%p52_p3), %v218_v1  ;;  %v226_v5 = vld [vmem:[%s1683_s29 + $0xb4] sm:$0xff] (%p52_p3)  ;;  %223 = vst [vmem:[%s1688_s30 + $0x24] sm:$0xff] (%p52_p3), %v222_v3  ;;  %v230_v7 = vld [vmem:[%s1683_s29 + $0xfc] sm:$0xff] (%p52_p3) }
  0x15   : > { %225 = vst [vmem:[%s1688_s30 + $0x30] sm:$0xff] %v224_v4  ;;  %227 = vst [vmem:[%s1688_s30 + $0x3c] sm:$0xff] %v226_v5  ;;  %v228_v6 = vld [vmem:[%s1683_s29 + $0xd8] sm:$0xff]  ;;  %v232_v8 = vld [vmem:[%s1683_s29 + $0x120] sm:$0xff] }
  0x16   : > { %229 = vst [vmem:[%s1688_s30 + $0x48] sm:$0xff] %v228_v6  ;;  %231 = vst [vmem:[%s1688_s30 + $0x54] sm:$0xff] %v230_v7  ;;  %v234_v9 = vld [vmem:[%s1683_s29 + $0x144] sm:$0xff]  ;;  %v238_v11 = vld [vmem:[%s1683_s29 + $0x18c] sm:$0xff] }
  0x17   : > { %233 = vst [vmem:[%s1688_s30 + $0x60] sm:$0xff] %v232_v8  ;;  %v236_v10 = vld [vmem:[%s1683_s29 + $0x168] sm:$0xff]  ;;  %235 = vst [vmem:[%s1688_s30 + $0x6c] sm:$0xff] %v234_v9  ;;  %v240_v12 = vld [vmem:[%s1683_s29 + $0x1b0] sm:$0xff] }
  0x18   : > { %237 = vst [vmem:[%s1688_s30 + $0x78] sm:$0xff] %v236_v10  ;;  %239 = vst [vmem:[%s1688_s30 + $0x84] sm:$0xff] %v238_v11  ;;  %v242_v13 = vld [vmem:[%s1683_s29 + $0x1d4] sm:$0xff]  ;;  %v246_v15 = vld [vmem:[%s1683_s29 + $0x21c] sm:$0xff] }
  0x19   : > { %v244_v14 = vld [vmem:[%s1683_s29 + $0x1f8] sm:$0xff]  ;;  %241 = vst [vmem:[%s1688_s30 + $0x90] sm:$0xff] %v240_v12  ;;  %243 = vst [vmem:[%s1688_s30 + $0x9c] sm:$0xff] %v242_v13  ;;  %v1272_v16 = vld [vmem:[%s1683_s29 + $0x8] sm:$0xf] }
  0x1a   : > { %245 = vst [vmem:[%s1688_s30 + $0xa8] sm:$0xff] %v244_v14  ;;  %v1274_v17 = vld [vmem:[%s1683_s29 + $0x2c] sm:$0xf]  ;;  %247 = vst [vmem:[%s1688_s30 + $0xb4] sm:$0xff] %v246_v15  ;;  %v1276_v18 = vld [vmem:[%s1683_s29 + $0x50] sm:$0xf] }
  0x1b   : > { %1273 = vst [vmem:[%s1688_s30 + $0x8] sm:$0xf] %v1272_v16  ;;  %1275 = vst [vmem:[%s1688_s30 + $0x14] sm:$0xf] %v1274_v17  ;;  %v1278_v19 = vld [vmem:[%s1683_s29 + $0x74] sm:$0xf] }
  0x1c   : > { %v1280_v20 = vld [vmem:[%s1683_s29 + $0x98] sm:$0xf]  ;;  %1277 = vst [vmem:[%s1688_s30 + $0x20] sm:$0xf] %v1276_v18  ;;  %1279 = vst [vmem:[%s1688_s30 + $0x2c] sm:$0xf] %v1278_v19 }
  0x1d   : > { %1281 = vst [vmem:[%s1688_s30 + $0x38] sm:$0xf] %v1280_v20  ;;  %v1282_v21 = vld [vmem:[%s1683_s29 + $0xbc] sm:$0xf]  ;;  %v1284_v22 = vld [vmem:[%s1683_s29 + $0xe0] sm:$0xf] }
  0x1e   : > { %v1286_v23 = vld [vmem:[%s1683_s29 + $0x104] sm:$0xf]  ;;  %1283 = vst [vmem:[%s1688_s30 + $0x44] sm:$0xf] %v1282_v21  ;;  %1285 = vst [vmem:[%s1688_s30 + $0x50] sm:$0xf] %v1284_v22 }
  0x1f   : > { %1287 = vst [vmem:[%s1688_s30 + $0x5c] sm:$0xf] %v1286_v23  ;;  %v1288_v24 = vld [vmem:[%s1683_s29 + $0x128] sm:$0xf]  ;;  %v1290_v25 = vld [vmem:[%s1683_s29 + $0x14c] sm:$0xf] }
  0x20   : > { %v1292_v26 = vld [vmem:[%s1683_s29 + $0x170] sm:$0xf]  ;;  %1289 = vst [vmem:[%s1688_s30 + $0x68] sm:$0xf] %v1288_v24  ;;  %1291 = vst [vmem:[%s1688_s30 + $0x74] sm:$0xf] %v1290_v25 }
  0x21   : > { %1293 = vst [vmem:[%s1688_s30 + $0x80] sm:$0xf] %v1292_v26  ;;  %v1294_v27 = vld [vmem:[%s1683_s29 + $0x194] sm:$0xf]  ;;  %v1296_v28 = vld [vmem:[%s1683_s29 + $0x1b8] sm:$0xf] }
  0x22   : > { %v1298_v29 = vld [vmem:[%s1683_s29 + $0x1dc] sm:$0xf]  ;;  %1295 = vst [vmem:[%s1688_s30 + $0x8c] sm:$0xf] %v1294_v27  ;;  %1297 = vst [vmem:[%s1688_s30 + $0x98] sm:$0xf] %v1296_v28 }
  0x23   : > { %1299 = vst [vmem:[%s1688_s30 + $0xa4] sm:$0xf] %v1298_v29  ;;  %v1300_v30 = vld [vmem:[%s1683_s29 + $0x200] sm:$0xf]  ;;  %v1302_v31 = vld [vmem:[%s1683_s29 + $0x224] sm:$0xf] }
  0x24   : > { %1301 = vst [vmem:[%s1688_s30 + $0xb0] sm:$0xf] %v1300_v30  ;;  %1303 = vst [vmem:[%s1688_s30 + $0xbc] sm:$0xf] %v1302_v31 }
  0x25 PF: > { %p1304_p6 = scmp.ge.s32.totalorder %s1612_s19, 1  ;;  %p303_p7 = scmp.lt.s32.totalorder %s1612_s19, 4 }
  0x27   : > { %p304_p8 = pnand %p1304_p6, %p303_p7 }
  0x28   : > { %s310_s5 = sand.u32 (!%p304_p8), 1, %s1596_s15   ;;  %s360_s6 = smul.u32 (!%p304_p8), 48, %s1604_s17 }
  0x29   : > { %307 = sbr.rel (%p304_p8) target bundleno = 405 (0x195), region = 50  ;;  %p1306_p10 = scmp.ne.s32.totalorder (!%p304_p8), %s1604_s17, 0 }
  0x2a   : > { %s1476_s7 = smul.u32 (!%p304_p8), 192, %s310_s5  ;;  %p361_p9 = scmp.lt.s32.totalorder (!%p304_p8), %s360_s6, 143 }
  0x2c   : > { %s1760_s12 = scalar_lea.vmem (!%p304_p8), [#allocation3], %s1476_s7 }
  0x30   : > { %s1893_s6 = smov (!%p361_p9, %s360_s6), 143  ;;  %394 = sbr.rel (%p1306_p10) target bundleno = 58 (0x3a), region = 58 }
  0x31   : > { %s1305_s8 = sshll.u32 %s1893_s6, 2  ;;  %v1614_v32 = vmov (!%p1306_p10), 0.0  }
  0x32   : > { %s1758_s11 = scalar_lea.vmem %s1882_s1, %s1305_s8  ;;  %395 = vst [vmem:[#allocation2] sm:$0xff] (!%p1306_p10), %v1614_v32  ;;  %396 = vst [vmem:[#allocation2 + $0x8] sm:$0xff] (!%p1306_p10), %v1614_v32 }
  0x33   : > { %397 = vst [vmem:[#allocation2 + $0x10] sm:$0xff] (!%p1306_p10), %v1614_v32  ;;  %398 = vst [vmem:[#allocation2 + $0x18] sm:$0xff] (!%p1306_p10), %v1614_v32 }
  0x34   : > { %399 = vst [vmem:[#allocation2 + $0x20] sm:$0xff] (!%p1306_p10), %v1614_v32  ;;  %400 = vst [vmem:[#allocation2 + $0x28] sm:$0xff] (!%p1306_p10), %v1614_v32 }
  0x35   : > { %401 = vst [vmem:[#allocation2 + $0x30] sm:$0xff] (!%p1306_p10), %v1614_v32  ;;  %402 = vst [vmem:[#allocation2 + $0x38] sm:$0xff] (!%p1306_p10), %v1614_v32 }
  0x36   : > { %403 = vst [vmem:[#allocation2 + $0x40] sm:$0xff] (!%p1306_p10), %v1614_v32  ;;  %404 = vst [vmem:[#allocation2 + $0x48] sm:$0xff] (!%p1306_p10), %v1614_v32 }
  0x37   : > { %405 = vst [vmem:[#allocation2 + $0x50] sm:$0xff] %v1614_v32  ;;  %406 = vst [vmem:[#allocation2 + $0x58] sm:$0xff] %v1614_v32 }
  0x38   : > { %407 = vst [vmem:[#allocation2 + $0x60] sm:$0xff] %v1614_v32  ;;  %408 = vst [vmem:[#allocation2 + $0x68] sm:$0xff] %v1614_v32 }
  0x39   : > { %409 = vst [vmem:[#allocation2 + $0x70] sm:$0xff] %v1614_v32  ;;  %410 = vst [vmem:[#allocation2 + $0x78] sm:$0xff] %v1614_v32 }
  0x3a PF: > { %v1518_v33 = vld [vmem:[%s1758_s11 + $0x40] sm:$0xff]   ;;  %v1521_v36 = vld [vmem:[%s1758_s11 + $0x48] sm:$0xff]   ;;  %v1524_v39 = vld [vmem:[%s1758_s11 + $0x50] sm:$0xff]   ;;  %p1355_p11 = scmp.ne.s32.totalorder %s1604_s17, 2 }
  0x3b   : > { %v1519_v34 = vld [vmem:[%s1758_s11] sm:$0xff]   ;;  %1363 = vmatprep.subr.bf16.mxu0 %v1518_v33  ;;  %v1522_v37 = vld [vmem:[%s1758_s11 + $0x8] sm:$0xff]   ;;  %v1525_v40 = vld [vmem:[%s1758_s11 + $0x10] sm:$0xff]  }
  0x3c   : > { %v1520_v35 = vld [vmem:[%s1758_s11 + $0x80] sm:$0xff]   ;;  %1364 = vmatpush3.bf16.msra.mxu0 %v1519_v34  ;;  %v1523_v38 = vld [vmem:[%s1758_s11 + $0x88] sm:$0xff]   ;;  %v1526_v41 = vld [vmem:[%s1758_s11 + $0x90] sm:$0xff]  }
  0x3d   : > { %1443 = vmatprep.subr.bf16.mxu1 %v1520_v35  ;;  %1365 = vmatprep.subr.bf16.mxu0 %v1521_v36  ;;  %v1527_v42 = vld [vmem:[%s1758_s11 + $0x58] sm:$0xff]   ;;  %v1530_v45 = vld [vmem:[%s1758_s11 + $0x60] sm:$0xff]   ;;  %v1533_v48 = vld [vmem:[%s1758_s11 + $0x68] sm:$0xff]  }
  0x3e   : > { %1444 = vmatpush3.bf16.msra.mxu1 %v1520_v35  ;;  %v1528_v43 = vld [vmem:[%s1758_s11 + $0x18] sm:$0xff]   ;;  %v1532_v46 = vld [vmem:[%s1758_s11 + $0xa0] sm:$0xff]   ;;  %v1535_v49 = vld [vmem:[%s1758_s11 + $0xa8] sm:$0xff]  }
  0x3f   : > { %1445 = vmatprep.subr.bf16.mxu1 %v1523_v38  ;;  %v1529_v44 = vld [vmem:[%s1758_s11 + $0x98] sm:$0xff]   ;;  %v1531_v47 = vld [vmem:[%s1758_s11 + $0x20] sm:$0xff]   ;;  %v1534_v50 = vld [vmem:[%s1758_s11 + $0x28] sm:$0xff]  }
  0x40   : > { %1366 = vmatpush3.bf16.msra.mxu0 %v1522_v37  ;;  %v1536_v51 = vld [vmem:[%s1758_s11 + $0x70] sm:$0xff]   ;;  %v1539_v54 = vld [vmem:[%s1758_s11 + $0x78] sm:$0xff]   ;;  %v1542_v59 = vld [vmem:[%s1760_s12] ss:$12 sps:$4 sm:$0xff]  }
  0x41   : > { %1367 = vmatprep.subr.bf16.mxu0 %v1524_v39  ;;  %v1537_v52 = vld [vmem:[%s1758_s11 + $0x30] sm:$0xff]   ;;  %v1541_v55 = vld [vmem:[%s1758_s11 + $0xb8] sm:$0xff]   ;;  %v1546_v61 = vld [vmem:[%s1760_s12 + $0x20] ss:$12 sps:$4 sm:$0xff]  }
  0x42   : > { %1446 = vmatpush3.bf16.msra.mxu1 %v1523_v38  ;;  %v1538_v53 = vld [vmem:[%s1758_s11 + $0xb0] sm:$0xff]   ;;  %v1540_v58 = vld [vmem:[%s1758_s11 + $0x38] sm:$0xff]   ;;  %v1562_v5 = vld [vmem:[%s1760_s12 + $0x80] ss:$12 sps:$4 sm:$0xff]  }
  0x43   : > { %1447 = vmatprep.subr.bf16.mxu1 %v1526_v41  ;;  %v1544_v56 = vld [vmem:[%s1760_s12 + $0x4] ss:$12 sps:$4 sm:$0xff]   ;;  %v1545_v57 = vld [vmem:[%s1760_s12 + $0x8] ss:$12 sps:$4 sm:$0xff]   ;;  %v1555_v4 = vld [vmem:[%s1760_s12 + $0x4c] ss:$12 sps:$4 sm:$0xff]  }
  0x44   : > { %1368 = vmatpush3.bf16.msra.mxu0 %v1525_v40  ;;  %811 = vmatprep.mubr.bf16.mxu0 %v1544_v56  ;;  %v1547_v60 = vld [vmem:[%s1760_s12 + $0x1c] ss:$12 sps:$4 sm:$0xff]   ;;  %v1553_v62 = vld [vmem:[%s1760_s12 + $0x38] ss:$12 sps:$4 sm:$0xff]   ;;  %v1550_v0 = vld [vmem:[%s1760_s12 + $0x34] ss:$12 sps:$4 sm:$0xff]  }
  0x45   : > { %1369 = vmatprep.subr.bf16.mxu0 %v1527_v42  ;;  %1459 = vmatprep.mubr.bf16.mxu1 %v1545_v57  ;;  %v1549_v63 = vld [vmem:[%s1760_s12 + $0x18] ss:$12 sps:$4 sm:$0xff]   ;;  %v1554_v1 = vld [vmem:[%s1760_s12 + $0x50] ss:$12 sps:$4 sm:$0xff]   ;;  %v1561_v2 = vld [vmem:[%s1760_s12 + $0x68] ss:$12 sps:$4 sm:$0xff]  }
  0x46   : > { %1448 = vmatpush3.bf16.msra.mxu1 %v1526_v41  ;;  %v1552_v3 = vld [vmem:[%s1760_s12 + $0x30] ss:$12 sps:$4 sm:$0xff]   ;;  %v1569_v6 = vld [vmem:[%s1760_s12 + $0x98] ss:$12 sps:$4 sm:$0xff]   ;;  %v1557_v7 = vld [vmem:[%s1760_s12 + $0x48] ss:$12 sps:$4 sm:$0xff]  }
  0x47   : > { %1449 = vmatprep.subr.bf16.mxu1 %v1529_v44  ;;  %v1558_v8 = vld [vmem:[%s1760_s12 + $0x64] ss:$12 sps:$4 sm:$0xff]   ;;  %v1560_v10 = vld [vmem:[%s1760_s12 + $0x60] ss:$12 sps:$4 sm:$0xff]   ;;  %v1563_v11 = vld [vmem:[%s1760_s12 + $0x7c] ss:$12 sps:$4 sm:$0xff]  }
  0x48   : > { %1370 = vmatpush3.bf16.msra.mxu0 %v1528_v43  ;;  %v1570_v9 = vld [vmem:[%s1760_s12 + $0xb0] ss:$12 sps:$4 sm:$0xff]   ;;  %v1565_v12 = vld [vmem:[%s1760_s12 + $0x78] ss:$12 sps:$4 sm:$0xff]   ;;  %v1566_v13 = vld [vmem:[%s1760_s12 + $0x94] ss:$12 sps:$4 sm:$0xff]  }
  0x49   : > { %1371 = vmatprep.subr.bf16.mxu0 %v1530_v45  ;;  %v1568_v14 = vld [vmem:[%s1760_s12 + $0x90] ss:$12 sps:$4 sm:$0xff]   ;;  %v1571_v15 = vld [vmem:[%s1760_s12 + $0xac] ss:$12 sps:$4 sm:$0xff]   ;;  %v1573_v16 = vld [vmem:[%s1760_s12 + $0xa8] ss:$12 sps:$4 sm:$0xff]  }
  0x4a   : > { %1450 = vmatpush3.bf16.msra.mxu1 %v1529_v44  ;;  %v411_v23 = vld [vmem:[#allocation2] sm:$0xff]  ;;  %v412_v28 = vld [vmem:[#allocation2 + $0x8] sm:$0xff]  ;;  %v413_v38 = vld [vmem:[#allocation2 + $0x10] sm:$0xff] }
  0x4b   : > { %1451 = vmatprep.subr.bf16.mxu1 %v1532_v46  ;;  %v414_v44 = vld [vmem:[#allocation2 + $0x18] sm:$0xff] }
  0x4c   : > { %1372 = vmatpush3.bf16.msra.mxu0 %v1531_v47 }
  0x4d   : > { %1373 = vmatprep.subr.bf16.mxu0 %v1533_v48 }
  0x4e   : > { %1452 = vmatpush3.bf16.msra.mxu1 %v1532_v46 }
  0x4f   : > { %1453 = vmatprep.subr.bf16.mxu1 %v1535_v49 }
  0x50   : > { %1374 = vmatpush3.bf16.msra.mxu0 %v1534_v50 }
  0x51   : > { %1375 = vmatprep.subr.bf16.mxu0 %v1536_v51 }
  0x52   : > { %1454 = vmatpush3.bf16.msra.mxu1 %v1535_v49 }
  0x53   : > { %1455 = vmatprep.subr.bf16.mxu1 %v1538_v53 }
  0x54   : > { %1376 = vmatpush3.bf16.msra.mxu0 %v1537_v52 }
  0x55   : > { %1377 = vmatprep.subr.bf16.mxu0 %v1539_v54 }
  0x56   : > { %1456 = vmatpush3.bf16.msra.mxu1 %v1538_v53 }
  0x57   : > { %1457 = vmatprep.subr.bf16.mxu1 %v1541_v55 }
  0x58   : > { %1378 = vmatpush3.bf16.msra.mxu0 %v1540_v58 }
  0x5a   : > { %1458 = vmatpush3.bf16.msra.mxu1 %v1541_v55  ;;  %v415_v55 = vld [vmem:[#allocation2 + $0x20] sm:$0xff] }
  0x5b   : > { %812 = vmatmul.mubr.bf16.vlgmr.msra.gmra.mrb[0].mxu0 %v1542_v59 }
  0x5c   : > { %819 = vmatprep.mubr.bf16.mxu0 %v1547_v60  ;;  %v416_v60 = vld [vmem:[#allocation2 + $0x28] sm:$0xff] }
  0x5d   : > { %1460 = vmatmul.mubr.bf16.vlgmr.msra.gmra.mrb[0].mxu1 %v1546_v61 }
  0x5e   : > { %1463 = vmatprep.mubr.bf16.mxu1 %v1553_v62 }
  0x63   : > { %820 = vmatmul.mubr.bf16.gmra.mrb[4].mxu0 %v1549_v63 }
  0x64   : > { %827 = vmatprep.mubr.bf16.mxu0 %v1550_v0 }
  0x65   : > { %1464 = vmatmul.mubr.bf16.gmra.mrb[4].mxu1 %v1554_v1 }
  0x66   : > { %1467 = vmatprep.mubr.bf16.mxu1 %v1561_v2 }
  0x6b   : > { %828 = vmatmul.mubr.bf16.gmra.mrb[8].mxu0 %v1552_v3 }
  0x6c   : > { %835 = vmatprep.mubr.bf16.mxu0 %v1555_v4 }
  0x6d   : > { %1468 = vmatmul.mubr.bf16.gmra.mrb[8].mxu1 %v1562_v5 }
  0x6e   : > { %1471 = vmatprep.mubr.bf16.mxu1 %v1569_v6  ;;  %v417_v6 = vld [vmem:[#allocation2 + $0x30] sm:$0xff] }
  0x73   : > { %836 = vmatmul.mubr.bf16.gmra.mrb[12].mxu0 %v1557_v7 }
  0x74   : > { %843 = vmatprep.mubr.bf16.mxu0 %v1558_v8 }
  0x75   : > { %1472 = vmatmul.mubr.bf16.gmra.mrb[12].mxu1 %v1570_v9 }
  0x7b   : > { %844 = vmatmul.mubr.bf16.gmra.mrb[16].mxu0 %v1560_v10 }
  0x7c   : > { %851 = vmatprep.mubr.bf16.mxu0 %v1563_v11 }
  0x83   : > { %852 = vmatmul.mubr.bf16.gmra.mrb[20].mxu0 %v1565_v12  ;;  %v418_v12 = vld [vmem:[#allocation2 + $0x38] sm:$0xff] }
  0x84   : > { %859 = vmatprep.mubr.bf16.mxu0 %v1566_v13 }
  0x8b   : > { %860 = vmatmul.mubr.bf16.gmra.mrb[24].mxu0 %v1568_v14 }
  0x8c   : > { %867 = vmatprep.mubr.bf16.mxu0 %v1571_v15 }
  0x93   : > { %868 = vmatmul.mubr.bf16.gmra.mrb[28].mxu0 %v1573_v16 }
 0x12e   : > { %v1379_v17 = vpop.f32.mrb[0].mxu0 }
 0x12f   : > { %v1380_v18 = vpop.f32.mrb[1].mxu0 }
 0x130   : > { %v1381_v19 = vadd.f32 %v1380_v18, %v1379_v17  ;;  %v1382_v20 = vpop.f32.mrb[2].mxu0  ;;  %v1461_v21 = vpop.f32.mrb[0].mxu1 }
 0x131   : > { %v1383_v22 = vpop.f32.mrb[3].mxu0  ;;  %v910_v24 = vpop.f32.mrb[1].mxu1 }
 0x132   : > { %v1384_v25 = vadd.f32 %v1383_v22, %v1382_v20  ;;  %v911_v26 = vadd.f32 %v1381_v19, %v910_v24  ;;  %v1462_v27 = vpop.f32.mrb[2].mxu1  ;;  %v419_v22 = vld [vmem:[#allocation2 + $0x40] sm:$0xff] }
 0x133   : > { %v913_v29 = vpop.f32.mrb[3].mxu1 }
 0x134   : > { %v973_v30 = vadd.f32 %v911_v26, %v411_v23  ;;  %v914_v31 = vadd.f32 %v1384_v25, %v913_v29  ;;  %v420_v25 = vld [vmem:[#allocation2 + $0x48] sm:$0xff] }
 0x136   : > { %989 = vst [vmem:[#allocation2] sm:$0xff] %v973_v30  ;;  %v974_v32 = vadd.f32 %v914_v31, %v412_v28  ;;  %v1385_v33 = vpop.f32.mrb[4].mxu0 }
 0x137   : > { %v1386_v34 = vpop.f32.mrb[5].mxu0 }
 0x138   : > { %990 = vst [vmem:[#allocation2 + $0x8] sm:$0xff] %v974_v32  ;;  %v1387_v35 = vadd.f32 %v1386_v34, %v1385_v33  ;;  %v1388_v36 = vpop.f32.mrb[6].mxu0  ;;  %v1465_v37 = vpop.f32.mrb[4].mxu1  ;;  %v421_v33 = vld [vmem:[#allocation2 + $0x50] sm:$0xff] }
 0x139   : > { %v1389_v39 = vpop.f32.mrb[7].mxu0  ;;  %v926_v40 = vpop.f32.mrb[5].mxu1 }
 0x13a   : > { %v919_v41 = vadd.f32 %v1461_v21, %v1387_v35  ;;  %v1390_v42 = vadd.f32 %v1389_v39, %v1388_v36  ;;  %v1466_v43 = vpop.f32.mrb[6].mxu1 }
 0x13b   : > { %v929_v45 = vpop.f32.mrb[7].mxu1 }
 0x13c   : > { %v975_v46 = vadd.f32 %v919_v41, %v413_v38  ;;  %v922_v47 = vadd.f32 %v1462_v27, %v1390_v42 }
 0x13e   : > { %991 = vst [vmem:[#allocation2 + $0x10] sm:$0xff] %v975_v46  ;;  %v976_v48 = vadd.f32 %v922_v47, %v414_v44  ;;  %v1391_v49 = vpop.f32.mrb[8].mxu0  ;;  %v423_v46 = vld [vmem:[#allocation2 + $0x60] sm:$0xff] }
 0x13f   : > { %v1392_v50 = vpop.f32.mrb[9].mxu0 }
 0x140   : > { %992 = vst [vmem:[#allocation2 + $0x18] sm:$0xff] %v976_v48  ;;  %v1393_v51 = vadd.f32 %v1392_v50, %v1391_v49  ;;  %v1394_v52 = vpop.f32.mrb[10].mxu0  ;;  %v1469_v53 = vpop.f32.mrb[8].mxu1  ;;  %v424_v49 = vld [vmem:[#allocation2 + $0x68] sm:$0xff] }
 0x141   : > { %v1395_v54 = vpop.f32.mrb[11].mxu0  ;;  %v942_v56 = vpop.f32.mrb[9].mxu1 }
 0x142   : > { %v1396_v57 = vadd.f32 %v1395_v54, %v1394_v52  ;;  %v927_v58 = vadd.f32 %v1393_v51, %v926_v40  ;;  %v1470_v59 = vpop.f32.mrb[10].mxu1 }
 0x143   : > { %v945_v61 = vpop.f32.mrb[11].mxu1 }
 0x144   : > { %v977_v62 = vadd.f32 %v927_v58, %v415_v55  ;;  %v930_v63 = vadd.f32 %v1396_v57, %v929_v45  ;;  %v425_v57 = vld [vmem:[#allocation2 + $0x70] sm:$0xff] }
 0x146   : > { %993 = vst [vmem:[#allocation2 + $0x20] sm:$0xff] %v977_v62  ;;  %v978_v0 = vadd.f32 %v930_v63, %v416_v60  ;;  %v1397_v1 = vpop.f32.mrb[12].mxu0 }
 0x147   : > { %v1398_v2 = vpop.f32.mrb[13].mxu0 }
 0x148   : > { %994 = vst [vmem:[#allocation2 + $0x28] sm:$0xff] %v978_v0  ;;  %v1399_v3 = vadd.f32 %v1398_v2, %v1397_v1  ;;  %v1400_v4 = vpop.f32.mrb[14].mxu0  ;;  %v1473_v5 = vpop.f32.mrb[12].mxu1  ;;  %v1009_v1 = vld [vmem:[#allocation2] sm:$0xff] (!%p1355_p11)  ;;  %v1010_v2 = vld [vmem:[#allocation2 + $0x8] sm:$0xff] (!%p1355_p11) }
 0x149   : > { %v1401_v7 = vpop.f32.mrb[15].mxu0  ;;  %v958_v8 = vpop.f32.mrb[13].mxu1  ;;  %1025 = vst [vmem:[%s1883_s2] sm:$0xff] (!%p1355_p11), %v1009_v1  ;;  %1026 = vst [vmem:[%s1883_s2 + $0x8] sm:$0xff] (!%p1355_p11), %v1010_v2 }
 0x14a   : > { %v935_v9 = vadd.f32 %v1465_v37, %v1399_v3  ;;  %v1402_v10 = vadd.f32 %v1401_v7, %v1400_v4  ;;  %v1474_v11 = vpop.f32.mrb[14].mxu1  ;;  %v422_v37 = vld [vmem:[#allocation2 + $0x58] sm:$0xff]  ;;  %v1011_v3 = vld [vmem:[#allocation2 + $0x10] sm:$0xff] (!%p1355_p11)  ;;  %v1063_v4 = vmul.f32 (!%p1355_p11), %v1009_v1, %v1009_v1 }
 0x14b   : > { %v961_v13 = vpop.f32.mrb[15].mxu1  ;;  %1027 = vst [vmem:[%s1883_s2 + $0x10] sm:$0xff] (!%p1355_p11), %v1011_v3  ;;  %v1065_v7 = vmul.f32 (!%p1355_p11), %v1011_v3, %v1011_v3 }
 0x14c   : > { %v979_v14 = vadd.f32 %v935_v9, %v417_v6  ;;  %v938_v15 = vadd.f32 %v1466_v43, %v1402_v10  ;;  %v1064_v6 = vmul.f32 (!%p1355_p11), %v1010_v2, %v1010_v2 }
 0x14d   : > { %v1013_v9 = vld [vmem:[#allocation2 + $0x20] sm:$0xff] (!%p1355_p11) }
 0x14e   : > { %995 = vst [vmem:[#allocation2 + $0x30] sm:$0xff] %v979_v14  ;;  %v980_v16 = vadd.f32 %v938_v15, %v418_v12  ;;  %v1403_v17 = vpop.f32.mrb[16].mxu0  ;;  %1029 = vst [vmem:[%s1883_s2 + $0x20] sm:$0xff] (!%p1355_p11), %v1013_v9  ;;  %v1079_v14 = vadd.f32 (!%p1355_p11), %v1064_v6, %v1063_v4 }
 0x14f   : > { %v1404_v18 = vpop.f32.mrb[17].mxu0  ;;  %v1014_v10 = vld [vmem:[#allocation2 + $0x28] sm:$0xff] (!%p1355_p11) }
 0x150   : > { %996 = vst [vmem:[#allocation2 + $0x38] sm:$0xff] %v980_v16  ;;  %v1405_v19 = vadd.f32 %v1404_v18, %v1403_v17  ;;  %v1406_v20 = vpop.f32.mrb[18].mxu0  ;;  %1030 = vst [vmem:[%s1883_s2 + $0x28] sm:$0xff] (!%p1355_p11), %v1014_v10 }
 0x151   : > { %v1407_v21 = vpop.f32.mrb[19].mxu0 }
 0x152   : > { %v1408_v23 = vadd.f32 %v1407_v21, %v1406_v20  ;;  %v943_v24 = vadd.f32 %v1405_v19, %v942_v56 }
 0x154   : > { %v981_v26 = vadd.f32 %v943_v24, %v419_v22  ;;  %v946_v27 = vadd.f32 %v1408_v23, %v945_v61  ;;  %v426_v61 = vld [vmem:[#allocation2 + $0x78] sm:$0xff]  ;;  %v1080_v23 = vadd.f32 (!%p1355_p11), %v1079_v14, %v1065_v7 }
 0x156   : > { %997 = vst [vmem:[#allocation2 + $0x40] sm:$0xff] %v981_v26  ;;  %v982_v28 = vadd.f32 %v946_v27, %v420_v25  ;;  %v1409_v29 = vpop.f32.mrb[20].mxu0  ;;  %v1067_v25 = vmul.f32 (!%p1355_p11), %v1013_v9, %v1013_v9 }
 0x157   : > { %v1410_v30 = vpop.f32.mrb[21].mxu0  ;;  %v1016_v12 = vld [vmem:[#allocation2 + $0x38] sm:$0xff] (!%p1355_p11) }
 0x158   : > { %998 = vst [vmem:[#allocation2 + $0x48] sm:$0xff] %v982_v28  ;;  %v1411_v31 = vadd.f32 %v1410_v30, %v1409_v29  ;;  %v1412_v32 = vpop.f32.mrb[22].mxu0  ;;  %1032 = vst [vmem:[%s1883_s2 + $0x38] sm:$0xff] (!%p1355_p11), %v1016_v12  ;;  %v1068_v29 = vmul.f32 (!%p1355_p11), %v1014_v10, %v1014_v10 }
 0x159   : > { %v1413_v34 = vpop.f32.mrb[23].mxu0 }
 0x15a   : > { %v951_v35 = vadd.f32 %v1469_v53, %v1411_v31  ;;  %v1414_v36 = vadd.f32 %v1413_v34, %v1412_v32 }
 0x15c   : > { %v983_v38 = vadd.f32 %v951_v35, %v421_v33  ;;  %v954_v39 = vadd.f32 %v1470_v59, %v1414_v36  ;;  %v1070_v35 = vmul.f32 (!%p1355_p11), %v1016_v12, %v1016_v12 }
 0x15e   : > { %999 = vst [vmem:[#allocation2 + $0x50] sm:$0xff] %v983_v38  ;;  %v984_v40 = vadd.f32 %v954_v39, %v422_v37  ;;  %v1415_v41 = vpop.f32.mrb[24].mxu0 }
 0x15f   : > { %v1416_v42 = vpop.f32.mrb[25].mxu0  ;;  %v1018_v17 = vld [vmem:[#allocation2 + $0x48] sm:$0xff] (!%p1355_p11) }
 0x160   : > { %1000 = vst [vmem:[#allocation2 + $0x58] sm:$0xff] %v984_v40  ;;  %v1417_v43 = vadd.f32 %v1416_v42, %v1415_v41  ;;  %v1418_v44 = vpop.f32.mrb[26].mxu0  ;;  %1034 = vst [vmem:[%s1883_s2 + $0x48] sm:$0xff] (!%p1355_p11), %v1018_v17  ;;  %v1072_v41 = vmul.f32 (!%p1355_p11), %v1018_v17, %v1018_v17 }
 0x161   : > { %v1419_v45 = vpop.f32.mrb[27].mxu0 }
 0x162   : > { %v1420_v47 = vadd.f32 %v1419_v45, %v1418_v44  ;;  %v959_v48 = vadd.f32 %v1417_v43, %v958_v8  ;;  %v1012_v8 = vld [vmem:[#allocation2 + $0x18] sm:$0xff] (!%p1355_p11) }
 0x163   : > { %1028 = vst [vmem:[%s1883_s2 + $0x18] sm:$0xff] (!%p1355_p11), %v1012_v8  ;;  %v1066_v16 = vmul.f32 (!%p1355_p11), %v1012_v8, %v1012_v8 }
 0x164   : > { %v985_v50 = vadd.f32 %v959_v48, %v423_v46  ;;  %v962_v51 = vadd.f32 %v1420_v47, %v961_v13  ;;  %v1017_v13 = vld [vmem:[#allocation2 + $0x40] sm:$0xff] (!%p1355_p11) }
 0x165   : > { %1033 = vst [vmem:[%s1883_s2 + $0x40] sm:$0xff] (!%p1355_p11), %v1017_v13  ;;  %v1019_v18 = vld [vmem:[#allocation2 + $0x50] sm:$0xff] (!%p1355_p11)  ;;  %v1081_v27 = vadd.f32 (!%p1355_p11), %v1080_v23, %v1066_v16  ;;  %v1071_v38 = vmul.f32 (!%p1355_p11), %v1017_v13, %v1017_v13 }
 0x166   : > { %1001 = vst [vmem:[#allocation2 + $0x60] sm:$0xff] %v985_v50  ;;  %v986_v52 = vadd.f32 %v962_v51, %v424_v49  ;;  %v1421_v53 = vpop.f32.mrb[28].mxu0  ;;  %1035 = vst [vmem:[%s1883_s2 + $0x50] sm:$0xff] (!%p1355_p11), %v1019_v18  ;;  %v1073_v44 = vmul.f32 (!%p1355_p11), %v1019_v18, %v1019_v18 }
 0x167   : > { %v1422_v54 = vpop.f32.mrb[29].mxu0  ;;  %v1020_v19 = vld [vmem:[#allocation2 + $0x58] sm:$0xff] (!%p1355_p11)  ;;  %v1082_v30 = vadd.f32 (!%p1355_p11), %v1081_v27, %v1067_v25 }
 0x168   : > { %1002 = vst [vmem:[#allocation2 + $0x68] sm:$0xff] %v986_v52  ;;  %v1423_v55 = vadd.f32 %v1422_v54, %v1421_v53  ;;  %v1424_v56 = vpop.f32.mrb[30].mxu0  ;;  %1036 = vst [vmem:[%s1883_s2 + $0x58] sm:$0xff] (!%p1355_p11), %v1020_v19  ;;  %v1074_v47 = vmul.f32 (!%p1355_p11), %v1020_v19, %v1020_v19 }
 0x169   : > { %v1425_v58 = vpop.f32.mrb[31].mxu0  ;;  %v1083_v33 = vadd.f32 (!%p1355_p11), %v1082_v30, %v1068_v29 }
 0x16a   : > { %v967_v59 = vadd.f32 %v1473_v5, %v1423_v55  ;;  %v1426_v60 = vadd.f32 %v1425_v58, %v1424_v56  ;;  %1008 = sbr.rel (%p1355_p11) target bundleno = 405 (0x195), region = 62  ;;  %v1041_v5 = vadd.f32 (!%p1355_p11), %v1010_v2, %v1009_v1 }
 0x16c   : > { %v987_v62 = vadd.f32 %v967_v59, %v425_v57  ;;  %v970_v63 = vadd.f32 %v1474_v11, %v1426_v60  ;;  %v1015_v11 = vld [vmem:[#allocation2 + $0x30] sm:$0xff] (!%p1355_p11)  ;;  %v1042_v15 = vadd.f32 (!%p1355_p11), %v1041_v5, %v1011_v3 }
 0x16d   : > { %1031 = vst [vmem:[%s1883_s2 + $0x30] sm:$0xff] (!%p1355_p11), %v1015_v11  ;;  %v1021_v20 = vld [vmem:[#allocation2 + $0x60] sm:$0xff] (!%p1355_p11)  ;;  %v1069_v32 = vmul.f32 (!%p1355_p11), %v1015_v11, %v1015_v11 }
 0x16e   : > { %1003 = vst [vmem:[#allocation2 + $0x70] sm:$0xff] %v987_v62  ;;  %v988_v0 = vadd.f32 %v970_v63, %v426_v61  ;;  %v1043_v24 = vadd.f32 (!%p1355_p11), %v1042_v15, %v1012_v8  ;;  %1037 = vst [vmem:[%s1883_s2 + $0x60] sm:$0xff] (!%p1355_p11), %v1021_v20  ;;  %v1075_v50 = vmul.f32 (!%p1355_p11), %v1021_v20, %v1021_v20 }
 0x16f   : > { %v1022_v21 = vld [vmem:[#allocation2 + $0x68] sm:$0xff] (!%p1355_p11)  ;;  %v1084_v36 = vadd.f32 (!%p1355_p11), %v1083_v33, %v1069_v32 }
 0x170   : > { %1004 = vst [vmem:[#allocation2 + $0x78] sm:$0xff] %v988_v0  ;;  %1038 = vst [vmem:[%s1883_s2 + $0x68] sm:$0xff] (!%p1355_p11), %v1022_v21  ;;  %v1044_v28 = vadd.f32 (!%p1355_p11), %v1043_v24, %v1013_v9  ;;  %v1076_v53 = vmul.f32 (!%p1355_p11), %v1022_v21, %v1022_v21 }
 0x171   : > { %v1085_v39 = vadd.f32 %v1084_v36, %v1070_v35 }
 0x172   : > { %v1045_v31 = vadd.f32 %v1044_v28, %v1014_v10 }
 0x173   : > { %v1086_v42 = vadd.f32 %v1085_v39, %v1071_v38 }
 0x174   : > { %v1046_v34 = vadd.f32 %v1045_v31, %v1015_v11 }
 0x175   : > { %v1023_v22 = vld [vmem:[#allocation2 + $0x70] sm:$0xff]  ;;  %v1087_v45 = vadd.f32 %v1086_v42, %v1072_v41 }
 0x176   : > { %1039 = vst [vmem:[%s1883_s2 + $0x70] sm:$0xff] %v1023_v22  ;;  %v1047_v37 = vadd.f32 %v1046_v34, %v1016_v12  ;;  %v1077_v56 = vmul.f32 %v1023_v22, %v1023_v22 }
 0x177   : > { %v1024_v26 = vld [vmem:[#allocation2 + $0x78] sm:$0xff]  ;;  %v1088_v48 = vadd.f32 %v1087_v45, %v1073_v44 }
 0x178   : > { %1040 = vst [vmem:[%s1883_s2 + $0x78] sm:$0xff] %v1024_v26  ;;  %v1048_v40 = vadd.f32 %v1047_v37, %v1017_v13  ;;  %v1078_v59 = vmul.f32 %v1024_v26, %v1024_v26 }
 0x179   : > { %v1089_v51 = vadd.f32 %v1088_v48, %v1074_v47 }
 0x17a   : > { %v1049_v43 = vadd.f32 %v1048_v40, %v1018_v17 }
 0x17b   : > { %v1090_v54 = vadd.f32 %v1089_v51, %v1075_v50 }
 0x17c   : > { %v1050_v46 = vadd.f32 %v1049_v43, %v1019_v18 }
 0x17d   : > { %v1091_v57 = vadd.f32 %v1090_v54, %v1076_v53 }
 0x17e   : > { %v1051_v49 = vadd.f32 %v1050_v46, %v1020_v19 }
 0x17f   : > { %v1092_v60 = vadd.f32 %v1091_v57, %v1077_v56 }
 0x180   : > { %v1052_v52 = vadd.f32 %v1051_v49, %v1021_v20 }
 0x181   : > { %v1093_v63 = vadd.f32 %v1092_v60, %v1078_v59 }
 0x182   : > { %v1053_v55 = vadd.f32 %v1052_v52, %v1022_v21 }
 0x183   : > { %v1094_v1 = vrot.slane %v1093_v63, 4 }
 0x184   : > { %v1054_v58 = vadd.f32 %v1053_v55, %v1023_v22 }
 0x185   : > { %v1095_v3 = vadd.f32 %v1094_v1, %v1093_v63 }
 0x186   : > { %v1055_v61 = vadd.f32 %v1054_v58, %v1024_v26 }
 0x187   : > { %v1096_v5 = vrot.slane %v1095_v3, 2 }
 0x188   : > { %v1056_v62 = vrot.slane %v1055_v61, 4 }
 0x189   : > { %v1097_v7 = vadd.f32 %v1096_v5, %v1095_v3 }
 0x18a   : > { %v1057_v0 = vadd.f32 %v1056_v62, %v1055_v61 }
 0x18b   : > { %v1098_v9 = vrot.slane %v1097_v7, 1 }
 0x18c   : > { %v1058_v2 = vrot.slane %v1057_v0, 2 }
 0x18d   : > { %v1099_v10 = vadd.f32 %v1098_v9, %v1097_v7 }
 0x18e   : > { %v1059_v4 = vadd.f32 %v1058_v2, %v1057_v0 }
 0x18f   : > { %1100 = vst [vmem:[%s1885_s4] sm:$0x1] %v1099_v10 }
 0x190   : > { %v1060_v6 = vrot.slane %v1059_v4, 1 }
 0x192   : > { %v1061_v8 = vadd.f32 %v1060_v6, %v1059_v4 }
 0x194   : > { %1062 = vst [vmem:[%s1884_s3] sm:$0x1] %v1061_v8 }
 0x195 PF: > { %s15_s19 = sadd.s32 1, %s1612_s19   ;;  %s1886_s15 = smov %s1600_s16 }
 0x196   : > { %p12_p12 = scmp.ge.s32.totalorder %s15_s19, 5   ;;  %s1887_s16 = smov %s1675_s23 }
 0x197   : > { %s1888_s17 = smov %s1608_s18  ;;  %s1889_s18 = smov %s1891_s20 }
 0x198   :  { %14 = sbr.rel (!%p12_p12) target bundleno = 3 (0x3), region = 130 }

// kernel: basic_block_forward.9
= control target key start
LH: loop header
LB: loop body
LE: loop exit
PB: predicated region body
PF: predicated region fallthrough
CT: control target
= control target key end

     0   :  { %s1098_s9 = smov 0   ;;  %s1100_s10 = smov 0   ;;  %s1267_s0 = inlined_call_operand.vmem [shape: bf16[128,1280], index: 0, kind: input, shape index: {}]   ;;  %s1268_s1 = inlined_call_operand.vmem [shape: bf16[1280,128], index: 1, kind: input, shape index: {}]   ;;  %s1269_s2 = inlined_call_operand.vmem [shape: f32[128,128], index: 2, kind: output, shape index: {}]  }
   0x1   :  { %s1102_s11 = smov 0   ;;  %s1104_s12 = smov 0  }
   0x2   :  { %s1106_s13 = smov 0  }
   0x3 LB: > { %s24_s14 = sadd.s32 1, %s1076_s12  ;;  %p47_p1 = scmp.ne.s32.totalorder %s1068_s10, %s1064_s9  ;;  %s1080_s13 = sphi %s1106_s13, %s12_s13   ;;  %s1076_s12 = sphi %s1104_s12, %s1273_s12   ;;  %s1072_s11 = sphi %s1102_s11, %s1272_s11   ;;  %s1068_s10 = sphi %s1100_s10, %s1271_s10   ;;  %s1064_s9 = sphi %s1098_s9, %s1270_s9  }
   0x4   : > { %p25_p0 = scmp.ge.s32.totalorder %s24_s14, 5  ;;  %p48_p2 = scmp.eq.s32.totalorder %s1080_s13, 0 }
   0x5   : > { %s40_s16 = sadd.s32 1, %s1068_s10  ;;  %p834_p5 = scmp.ge.s32.totalorder %s1080_s13, 5 }
   0x6   : > { %s1275_s14 = smov (%p25_p0, %s24_s14), 0  ;;  %p49_p3 = por %p48_p2, %p47_p1 }
   0x7   : > { %s36_s15 = ssub.s32 %s1076_s12, %s1275_s14  ;;  %129 = sbr.rel (%p834_p5) target bundleno = 26 (0x1a), region = 16 }
   0x8   : > { %p38_p4 = scmp.eq.s32.totalorder %s36_s15, 0 }
   0xa   : > { %s1133_s17 = scalar_select %p38_p4, %s1068_s10, %s40_s16  }
   0xe   : > { %132 = sbr.rel (!%p49_p3) target bundleno = 26 (0x1a), region = 20  ;;  %s134_s18 = sand.u32 (%p49_p3), 1, %s1068_s10  }
   0xf   : > { %s880_s19 = sshll.u32 (%p49_p3), %s1076_s12, 3  ;;  %s835_s20 = sshll.u32 (%p49_p3), %s134_s18, 7 }
  0x10   : > { %s1141_s23 = scalar_lea.vmem (%p49_p3), %s1267_s0, %s880_s19  ;;  %s136_s24 = scalar_lea.vmem (%p49_p3), [#allocation3], %s835_s20 }
  0x11   : > { %v200_v0 = vld [vmem:[%s1141_s23] sm:$0xff] (%p49_p3)  ;;  %v202_v1 = vld [vmem:[%s1141_s23 + $0x28] sm:$0xff] (%p49_p3)  ;;  %v204_v2 = vld [vmem:[%s1141_s23 + $0x50] sm:$0xff] (%p49_p3) }
  0x12   : > { %201 = vst [vmem:[%s136_s24] sm:$0xff] (%p49_p3), %v200_v0  ;;  %203 = vst [vmem:[%s136_s24 + $0x8] sm:$0xff] (%p49_p3), %v202_v1  ;;  %v206_v3 = vld [vmem:[%s1141_s23 + $0x78] sm:$0xff] (%p49_p3)  ;;  %v208_v4 = vld [vmem:[%s1141_s23 + $0xa0] sm:$0xff] (%p49_p3) }
  0x13   : > { %205 = vst [vmem:[%s136_s24 + $0x10] sm:$0xff] (%p49_p3), %v204_v2  ;;  %v210_v5 = vld [vmem:[%s1141_s23 + $0xc8] sm:$0xff] (%p49_p3)  ;;  %207 = vst [vmem:[%s136_s24 + $0x18] sm:$0xff] (%p49_p3), %v206_v3  ;;  %v212_v6 = vld [vmem:[%s1141_s23 + $0xf0] sm:$0xff] (%p49_p3) }
  0x14   : > { %209 = vst [vmem:[%s136_s24 + $0x20] sm:$0xff] (%p49_p3), %v208_v4  ;;  %211 = vst [vmem:[%s136_s24 + $0x28] sm:$0xff] (%p49_p3), %v210_v5  ;;  %v214_v7 = vld [vmem:[%s1141_s23 + $0x118] sm:$0xff] (%p49_p3)  ;;  %v216_v8 = vld [vmem:[%s1141_s23 + $0x140] sm:$0xff] (%p49_p3) }
  0x15   : > { %213 = vst [vmem:[%s136_s24 + $0x30] sm:$0xff] %v212_v6  ;;  %215 = vst [vmem:[%s136_s24 + $0x38] sm:$0xff] %v214_v7  ;;  %v218_v9 = vld [vmem:[%s1141_s23 + $0x168] sm:$0xff]  ;;  %v220_v10 = vld [vmem:[%s1141_s23 + $0x190] sm:$0xff] }
  0x16   : > { %217 = vst [vmem:[%s136_s24 + $0x40] sm:$0xff] %v216_v8  ;;  %v222_v11 = vld [vmem:[%s1141_s23 + $0x1b8] sm:$0xff]  ;;  %219 = vst [vmem:[%s136_s24 + $0x48] sm:$0xff] %v218_v9  ;;  %v224_v12 = vld [vmem:[%s1141_s23 + $0x1e0] sm:$0xff] }
  0x17   : > { %221 = vst [vmem:[%s136_s24 + $0x50] sm:$0xff] %v220_v10  ;;  %223 = vst [vmem:[%s136_s24 + $0x58] sm:$0xff] %v222_v11  ;;  %v226_v13 = vld [vmem:[%s1141_s23 + $0x208] sm:$0xff]  ;;  %v228_v14 = vld [vmem:[%s1141_s23 + $0x230] sm:$0xff] }
  0x18   : > { %225 = vst [vmem:[%s136_s24 + $0x60] sm:$0xff] %v224_v12  ;;  %227 = vst [vmem:[%s136_s24 + $0x68] sm:$0xff] %v226_v13  ;;  %v230_v15 = vld [vmem:[%s1141_s23 + $0x258] sm:$0xff] }
  0x19   : > { %229 = vst [vmem:[%s136_s24 + $0x70] sm:$0xff] %v228_v14  ;;  %231 = vst [vmem:[%s136_s24 + $0x78] sm:$0xff] %v230_v15 }
  0x1a PF: > { %p838_p6 = scmp.ge.s32.totalorder %s1080_s13, 1  ;;  %p248_p7 = scmp.lt.s32.totalorder %s1080_s13, 6 }
  0x1c   : > { %p249_p8 = pnand %p838_p6, %p248_p7 }
  0x1d   : > { %s255_s25 = sand.u32 (!%p249_p8), 1, %s1064_s9   ;;  %s840_s26 = sshll.u32 (!%p249_p8), %s1072_s11, 5 }
  0x1e   : > { %252 = sbr.rel (%p249_p8) target bundleno = 333 (0x14d), region = 62  ;;  %s839_s27 = sshll.u32 (!%p249_p8), %s255_s25, 7 }
  0x1f   : > { %p290_p9 = scmp.lt.s32.totalorder (!%p249_p8), %s840_s26, 159  ;;  %s1168_s4 = scalar_lea.vmem (!%p249_p8), [#allocation3], %s839_s27 }
  0x20   : > { %p842_p10 = scmp.ne.s32.totalorder (!%p249_p8), %s1072_s11, 0 }
  0x25   : > { %s1277_s26 = smov (!%p290_p9, %s840_s26), 159  ;;  %311 = sbr.rel (%p842_p10) target bundleno = 47 (0x2f), region = 70 }
  0x26   : > { %s841_s28 = sshll.u32 %s1277_s26, 2  ;;  %v1082_v16 = vmov (!%p842_p10), 0.0  }
  0x27   : > { %s1166_s3 = scalar_lea.vmem %s1268_s1, %s841_s28  ;;  %312 = vst [vmem:[#allocation2] sm:$0xff] (!%p842_p10), %v1082_v16  ;;  %313 = vst [vmem:[#allocation2 + $0x8] sm:$0xff] (!%p842_p10), %v1082_v16 }
  0x28   : > { %314 = vst [vmem:[#allocation2 + $0x10] sm:$0xff] (!%p842_p10), %v1082_v16  ;;  %315 = vst [vmem:[#allocation2 + $0x18] sm:$0xff] (!%p842_p10), %v1082_v16 }
  0x29   : > { %316 = vst [vmem:[#allocation2 + $0x20] sm:$0xff] (!%p842_p10), %v1082_v16  ;;  %317 = vst [vmem:[#allocation2 + $0x28] sm:$0xff] (!%p842_p10), %v1082_v16 }
  0x2a   : > { %318 = vst [vmem:[#allocation2 + $0x30] sm:$0xff] (!%p842_p10), %v1082_v16  ;;  %319 = vst [vmem:[#allocation2 + $0x38] sm:$0xff] (!%p842_p10), %v1082_v16 }
  0x2b   : > { %320 = vst [vmem:[#allocation2 + $0x40] sm:$0xff] (!%p842_p10), %v1082_v16  ;;  %321 = vst [vmem:[#allocation2 + $0x48] sm:$0xff] (!%p842_p10), %v1082_v16 }
  0x2c   : > { %322 = vst [vmem:[#allocation2 + $0x50] sm:$0xff] %v1082_v16  ;;  %323 = vst [vmem:[#allocation2 + $0x58] sm:$0xff] %v1082_v16 }
  0x2d   : > { %324 = vst [vmem:[#allocation2 + $0x60] sm:$0xff] %v1082_v16  ;;  %325 = vst [vmem:[#allocation2 + $0x68] sm:$0xff] %v1082_v16 }
  0x2e   : > { %326 = vst [vmem:[#allocation2 + $0x70] sm:$0xff] %v1082_v16  ;;  %327 = vst [vmem:[#allocation2 + $0x78] sm:$0xff] %v1082_v16 }
  0x2f PF: > { %v1002_v17 = vld [vmem:[%s1166_s3 + $0x40] sm:$0xff]   ;;  %v1004_v19 = vld [vmem:[%s1166_s3 + $0x48] sm:$0xff]   ;;  %v1006_v21 = vld [vmem:[%s1166_s3 + $0x50] sm:$0xff]   ;;  %p875_p11 = scmp.ne.s32.totalorder %s1072_s11, 4 }
  0x30   : > { %v1003_v18 = vld [vmem:[%s1166_s3] sm:$0xff]   ;;  %881 = vmatprep.subr.bf16.mxu0 %v1002_v17  ;;  %945 = vmatprep.subr.bf16.mxu1 %v1002_v17  ;;  %v1005_v20 = vld [vmem:[%s1166_s3 + $0x8] sm:$0xff]   ;;  %v1007_v22 = vld [vmem:[%s1166_s3 + $0x10] sm:$0xff]  }
  0x31   : > { %882 = vmatpush3.bf16.msra.mxu0 %v1003_v18  ;;  %953 = vmatpush3.bf16.msra.mxu1 %v1003_v18  ;;  %v1008_v23 = vld [vmem:[%s1166_s3 + $0x58] sm:$0xff]   ;;  %v1010_v25 = vld [vmem:[%s1166_s3 + $0x60] sm:$0xff]   ;;  %v1012_v27 = vld [vmem:[%s1166_s3 + $0x68] sm:$0xff]  }
  0x32   : > { %883 = vmatprep.subr.bf16.mxu0 %v1004_v19  ;;  %946 = vmatprep.subr.bf16.mxu1 %v1004_v19  ;;  %v1009_v24 = vld [vmem:[%s1166_s3 + $0x18] sm:$0xff]   ;;  %v1011_v26 = vld [vmem:[%s1166_s3 + $0x20] sm:$0xff]   ;;  %v1013_v30 = vld [vmem:[%s1166_s3 + $0x28] sm:$0xff]  }
  0x33   : > { %v1020_v28 = vld [vmem:[%s1168_s4 + $0x4] ss:$8 sps:$4 sm:$0xff]   ;;  %v1014_v31 = vld [vmem:[%s1166_s3 + $0x70] sm:$0xff]   ;;  %v1016_v33 = vld [vmem:[%s1166_s3 + $0x78] sm:$0xff]  }
  0x34   : > { %v1023_v29 = vld [vmem:[%s1168_s4 + $0x44] ss:$8 sps:$4 sm:$0xff]   ;;  %600 = vmatprep.mubr.bf16.mxu0 %v1020_v28  ;;  %v1015_v32 = vld [vmem:[%s1166_s3 + $0x30] sm:$0xff]   ;;  %v1017_v34 = vld [vmem:[%s1166_s3 + $0x38] sm:$0xff]  }
  0x35   : > { %884 = vmatpush3.bf16.msra.mxu0 %v1005_v20  ;;  %954 = vmatpush3.bf16.msra.mxu1 %v1005_v20  ;;  %v1018_v35 = vld [vmem:[%s1168_s4] ss:$8 sps:$4 sm:$0xff]   ;;  %v1024_v37 = vld [vmem:[%s1168_s4 + $0x14] ss:$8 sps:$4 sm:$0xff]   ;;  %v1028_v39 = vld [vmem:[%s1168_s4 + $0x10] ss:$8 sps:$4 sm:$0xff]  }
  0x36   : > { %885 = vmatprep.subr.bf16.mxu0 %v1006_v21  ;;  %947 = vmatprep.subr.bf16.mxu1 %v1006_v21  ;;  %v1021_v36 = vld [vmem:[%s1168_s4 + $0x40] ss:$8 sps:$4 sm:$0xff]   ;;  %v1026_v38 = vld [vmem:[%s1168_s4 + $0x54] ss:$8 sps:$4 sm:$0xff]   ;;  %v1029_v40 = vld [vmem:[%s1168_s4 + $0x50] ss:$8 sps:$4 sm:$0xff]  }
  0x37   : > { %632 = vmatprep.mubr.bf16.mxu1 %v1023_v29  ;;  %v1030_v41 = vld [vmem:[%s1168_s4 + $0x24] ss:$8 sps:$4 sm:$0xff]   ;;  %v1034_v43 = vld [vmem:[%s1168_s4 + $0x20] ss:$8 sps:$4 sm:$0xff]   ;;  %v1036_v45 = vld [vmem:[%s1168_s4 + $0x34] ss:$8 sps:$4 sm:$0xff]  }
  0x38   : > { %v1032_v42 = vld [vmem:[%s1168_s4 + $0x64] ss:$8 sps:$4 sm:$0xff]   ;;  %v1035_v44 = vld [vmem:[%s1168_s4 + $0x60] ss:$8 sps:$4 sm:$0xff]   ;;  %v1038_v46 = vld [vmem:[%s1168_s4 + $0x74] ss:$8 sps:$4 sm:$0xff]  }
  0x39   : > { %886 = vmatpush3.bf16.msra.mxu0 %v1007_v22  ;;  %955 = vmatpush3.bf16.msra.mxu1 %v1007_v22  ;;  %v1040_v47 = vld [vmem:[%s1168_s4 + $0x30] ss:$8 sps:$4 sm:$0xff]   ;;  %v328_v51 = vld [vmem:[#allocation2] sm:$0xff]  ;;  %v329_v59 = vld [vmem:[#allocation2 + $0x8] sm:$0xff] }
  0x3a   : > { %887 = vmatprep.subr.bf16.mxu0 %v1008_v23  ;;  %948 = vmatprep.subr.bf16.mxu1 %v1008_v23  ;;  %v1041_v48 = vld [vmem:[%s1168_s4 + $0x70] ss:$8 sps:$4 sm:$0xff]   ;;  %v336_v53 = vld [vmem:[#allocation2 + $0x40] sm:$0xff]  ;;  %v337_v61 = vld [vmem:[#allocation2 + $0x48] sm:$0xff] }
  0x3b   : > { %v330_v7 = vld [vmem:[#allocation2 + $0x10] sm:$0xff]  ;;  %v331_v15 = vld [vmem:[#allocation2 + $0x18] sm:$0xff]  ;;  %v340_v29 = vld [vmem:[#allocation2 + $0x60] sm:$0xff] }
  0x3c   : > { %v338_v9 = vld [vmem:[#allocation2 + $0x50] sm:$0xff]  ;;  %v339_v17 = vld [vmem:[#allocation2 + $0x58] sm:$0xff] }
  0x3d   : > { %888 = vmatpush3.bf16.msra.mxu0 %v1009_v24  ;;  %956 = vmatpush3.bf16.msra.mxu1 %v1009_v24 }
  0x3e   : > { %889 = vmatprep.subr.bf16.mxu0 %v1010_v25  ;;  %949 = vmatprep.subr.bf16.mxu1 %v1010_v25 }
  0x41   : > { %890 = vmatpush3.bf16.msra.mxu0 %v1011_v26  ;;  %957 = vmatpush3.bf16.msra.mxu1 %v1011_v26 }
  0x42   : > { %891 = vmatprep.subr.bf16.mxu0 %v1012_v27  ;;  %950 = vmatprep.subr.bf16.mxu1 %v1012_v27  ;;  %v332_v27 = vld [vmem:[#allocation2 + $0x20] sm:$0xff] }
  0x45   : > { %892 = vmatpush3.bf16.msra.mxu0 %v1013_v30  ;;  %958 = vmatpush3.bf16.msra.mxu1 %v1013_v30 }
  0x46   : > { %893 = vmatprep.subr.bf16.mxu0 %v1014_v31  ;;  %951 = vmatprep.subr.bf16.mxu1 %v1014_v31 }
  0x49   : > { %894 = vmatpush3.bf16.msra.mxu0 %v1015_v32  ;;  %959 = vmatpush3.bf16.msra.mxu1 %v1015_v32 }
  0x4a   : > { %895 = vmatprep.subr.bf16.mxu0 %v1016_v33  ;;  %952 = vmatprep.subr.bf16.mxu1 %v1016_v33 }
  0x4d   : > { %896 = vmatpush3.bf16.msra.mxu0 %v1017_v34  ;;  %960 = vmatpush3.bf16.msra.mxu1 %v1017_v34 }
  0x50   : > { %601 = vmatmul.mubr.bf16.vlgmr.msra.gmra.mrb[0].mxu0 %v1018_v35  ;;  %633 = vmatmul.mubr.bf16.vlgmr.msra.gmra.mrb[0].mxu1 %v1021_v36  ;;  %v333_v35 = vld [vmem:[#allocation2 + $0x28] sm:$0xff] }
  0x51   : > { %608 = vmatprep.mubr.bf16.mxu0 %v1024_v37  ;;  %640 = vmatprep.mubr.bf16.mxu1 %v1026_v38  ;;  %v341_v37 = vld [vmem:[#allocation2 + $0x68] sm:$0xff] }
  0x58   : > { %609 = vmatmul.mubr.bf16.gmra.mrb[4].mxu0 %v1028_v39  ;;  %641 = vmatmul.mubr.bf16.gmra.mrb[4].mxu1 %v1029_v40 }
  0x59   : > { %616 = vmatprep.mubr.bf16.mxu0 %v1030_v41  ;;  %648 = vmatprep.mubr.bf16.mxu1 %v1032_v42 }
  0x60   : > { %617 = vmatmul.mubr.bf16.gmra.mrb[8].mxu0 %v1034_v43  ;;  %649 = vmatmul.mubr.bf16.gmra.mrb[8].mxu1 %v1035_v44 }
  0x61   : > { %624 = vmatprep.mubr.bf16.mxu0 %v1036_v45  ;;  %656 = vmatprep.mubr.bf16.mxu1 %v1038_v46 }
  0x68   : > { %625 = vmatmul.mubr.bf16.gmra.mrb[12].mxu0 %v1040_v47  ;;  %657 = vmatmul.mubr.bf16.gmra.mrb[12].mxu1 %v1041_v48  ;;  %v334_v47 = vld [vmem:[#allocation2 + $0x30] sm:$0xff] }
 0x123   : > { %v897_v49 = vpop.f32.mrb[0].mxu0  ;;  %v921_v50 = vpop.f32.mrb[0].mxu1 }
 0x124   : > { %v898_v52 = vpop.f32.mrb[1].mxu0  ;;  %v922_v54 = vpop.f32.mrb[1].mxu1 }
 0x125   : > { %v899_v55 = vadd.f32 %v898_v52, %v897_v49  ;;  %v923_v56 = vadd.f32 %v922_v54, %v921_v50  ;;  %v900_v57 = vpop.f32.mrb[2].mxu0  ;;  %v924_v58 = vpop.f32.mrb[2].mxu1  ;;  %v342_v49 = vld [vmem:[#allocation2 + $0x70] sm:$0xff] }
 0x126   : > { %v901_v60 = vpop.f32.mrb[3].mxu0  ;;  %v925_v62 = vpop.f32.mrb[3].mxu1 }
 0x127   : > { %v665_v63 = vadd.f32 %v899_v55, %v328_v51  ;;  %v673_v0 = vadd.f32 %v923_v56, %v336_v53  ;;  %v902_v1 = vadd.f32 %v901_v60, %v900_v57  ;;  %v926_v2 = vadd.f32 %v925_v62, %v924_v58  ;;  %v335_v55 = vld [vmem:[#allocation2 + $0x38] sm:$0xff] }
 0x128   : > { %v343_v57 = vld [vmem:[#allocation2 + $0x78] sm:$0xff] }
 0x129   : > { %681 = vst [vmem:[#allocation2] sm:$0xff] %v665_v63  ;;  %689 = vst [vmem:[#allocation2 + $0x40] sm:$0xff] %v673_v0  ;;  %v666_v3 = vadd.f32 %v902_v1, %v329_v59  ;;  %v674_v4 = vadd.f32 %v926_v2, %v337_v61 }
 0x12b   : > { %682 = vst [vmem:[#allocation2 + $0x8] sm:$0xff] %v666_v3  ;;  %690 = vst [vmem:[#allocation2 + $0x48] sm:$0xff] %v674_v4  ;;  %v903_v5 = vpop.f32.mrb[4].mxu0  ;;  %v927_v6 = vpop.f32.mrb[4].mxu1 }
 0x12c   : > { %v904_v8 = vpop.f32.mrb[5].mxu0  ;;  %v928_v10 = vpop.f32.mrb[5].mxu1 }
 0x12d   : > { %v905_v11 = vadd.f32 %v904_v8, %v903_v5  ;;  %v929_v12 = vadd.f32 %v928_v10, %v927_v6  ;;  %v906_v13 = vpop.f32.mrb[6].mxu0  ;;  %v930_v14 = vpop.f32.mrb[6].mxu1 }
 0x12e   : > { %v907_v16 = vpop.f32.mrb[7].mxu0  ;;  %v931_v18 = vpop.f32.mrb[7].mxu1 }
 0x12f   : > { %v667_v19 = vadd.f32 %v905_v11, %v330_v7  ;;  %v675_v20 = vadd.f32 %v929_v12, %v338_v9  ;;  %v908_v21 = vadd.f32 %v907_v16, %v906_v13  ;;  %v932_v22 = vadd.f32 %v931_v18, %v930_v14 }
 0x130   : > { %v701_v1 = vld [vmem:[#allocation2] sm:$0xff] (!%p875_p11) }
 0x131   : > { %683 = vst [vmem:[#allocation2 + $0x10] sm:$0xff] %v667_v19  ;;  %691 = vst [vmem:[#allocation2 + $0x50] sm:$0xff] %v675_v20  ;;  %v668_v23 = vadd.f32 %v908_v21, %v331_v15  ;;  %v676_v24 = vadd.f32 %v932_v22, %v339_v17  ;;  %v709_v9 = vld [vmem:[#allocation2 + $0x40] sm:$0xff] (!%p875_p11) }
 0x132   : > { %v702_v2 = vld [vmem:[#allocation2 + $0x8] sm:$0xff] (!%p875_p11)  ;;  %717 = vst [vmem:[%s1269_s2] sm:$0xff] (!%p875_p11), %v701_v1  ;;  %725 = vst [vmem:[%s1269_s2 + $0x40] sm:$0xff] (!%p875_p11), %v709_v9 }
 0x133   : > { %684 = vst [vmem:[#allocation2 + $0x18] sm:$0xff] %v668_v23  ;;  %692 = vst [vmem:[#allocation2 + $0x58] sm:$0xff] %v676_v24  ;;  %v909_v25 = vpop.f32.mrb[8].mxu0  ;;  %v933_v26 = vpop.f32.mrb[8].mxu1  ;;  %v710_v10 = vld [vmem:[#allocation2 + $0x48] sm:$0xff] (!%p875_p11) }
 0x134   : > { %v910_v28 = vpop.f32.mrb[9].mxu0  ;;  %v934_v30 = vpop.f32.mrb[9].mxu1  ;;  %718 = vst [vmem:[%s1269_s2 + $0x8] sm:$0xff] (!%p875_p11), %v702_v2  ;;  %726 = vst [vmem:[%s1269_s2 + $0x48] sm:$0xff] (!%p875_p11), %v710_v10 }
 0x135   : > { %v911_v31 = vadd.f32 %v910_v28, %v909_v25  ;;  %v935_v32 = vadd.f32 %v934_v30, %v933_v26  ;;  %v912_v33 = vpop.f32.mrb[10].mxu0  ;;  %v936_v34 = vpop.f32.mrb[10].mxu1 }
 0x136   : > { %v913_v36 = vpop.f32.mrb[11].mxu0  ;;  %v937_v38 = vpop.f32.mrb[11].mxu1 }
 0x137   : > { %v669_v39 = vadd.f32 %v911_v31, %v332_v27  ;;  %v677_v40 = vadd.f32 %v935_v32, %v340_v29  ;;  %v914_v41 = vadd.f32 %v913_v36, %v912_v33  ;;  %v938_v42 = vadd.f32 %v937_v38, %v936_v34 }
 0x138   : > { %v703_v3 = vld [vmem:[#allocation2 + $0x10] sm:$0xff] (!%p875_p11) }
 0x139   : > { %685 = vst [vmem:[#allocation2 + $0x20] sm:$0xff] %v669_v39  ;;  %693 = vst [vmem:[#allocation2 + $0x60] sm:$0xff] %v677_v40  ;;  %v670_v43 = vadd.f32 %v914_v41, %v333_v35  ;;  %v678_v44 = vadd.f32 %v938_v42, %v341_v37  ;;  %v711_v11 = vld [vmem:[#allocation2 + $0x50] sm:$0xff] (!%p875_p11) }
 0x13a   : > { %719 = vst [vmem:[%s1269_s2 + $0x10] sm:$0xff] (!%p875_p11), %v703_v3  ;;  %v704_v4 = vld [vmem:[#allocation2 + $0x18] sm:$0xff] (!%p875_p11)  ;;  %727 = vst [vmem:[%s1269_s2 + $0x50] sm:$0xff] (!%p875_p11), %v711_v11 }
 0x13b   : > { %686 = vst [vmem:[#allocation2 + $0x28] sm:$0xff] %v670_v43  ;;  %694 = vst [vmem:[#allocation2 + $0x68] sm:$0xff] %v678_v44  ;;  %v915_v45 = vpop.f32.mrb[12].mxu0  ;;  %v939_v46 = vpop.f32.mrb[12].mxu1  ;;  %v712_v12 = vld [vmem:[#allocation2 + $0x58] sm:$0xff] (!%p875_p11) }
 0x13c   : > { %v916_v48 = vpop.f32.mrb[13].mxu0  ;;  %v940_v50 = vpop.f32.mrb[13].mxu1  ;;  %720 = vst [vmem:[%s1269_s2 + $0x18] sm:$0xff] (!%p875_p11), %v704_v4  ;;  %728 = vst [vmem:[%s1269_s2 + $0x58] sm:$0xff] (!%p875_p11), %v712_v12 }
 0x13d   : > { %v917_v51 = vadd.f32 %v916_v48, %v915_v45  ;;  %v941_v52 = vadd.f32 %v940_v50, %v939_v46  ;;  %v918_v53 = vpop.f32.mrb[14].mxu0  ;;  %v942_v54 = vpop.f32.mrb[14].mxu1  ;;  %700 = sbr.rel (%p875_p11) target bundleno = 333 (0x14d), region = 74 }
 0x13e   : > { %v919_v56 = vpop.f32.mrb[15].mxu0  ;;  %v943_v58 = vpop.f32.mrb[15].mxu1 }
 0x13f   : > { %v671_v59 = vadd.f32 %v917_v51, %v334_v47  ;;  %v679_v60 = vadd.f32 %v941_v52, %v342_v49  ;;  %v920_v61 = vadd.f32 %v919_v56, %v918_v53  ;;  %v944_v62 = vadd.f32 %v943_v58, %v942_v54 }
 0x140   : > { %v705_v5 = vld [vmem:[#allocation2 + $0x20] sm:$0xff] (!%p875_p11) }
 0x141   : > { %687 = vst [vmem:[#allocation2 + $0x30] sm:$0xff] %v671_v59  ;;  %695 = vst [vmem:[#allocation2 + $0x70] sm:$0xff] %v679_v60  ;;  %v672_v63 = vadd.f32 %v920_v61, %v335_v55  ;;  %v680_v0 = vadd.f32 %v944_v62, %v343_v57  ;;  %v713_v13 = vld [vmem:[#allocation2 + $0x60] sm:$0xff] (!%p875_p11) }
 0x142   : > { %v706_v6 = vld [vmem:[#allocation2 + $0x28] sm:$0xff] (!%p875_p11)  ;;  %721 = vst [vmem:[%s1269_s2 + $0x20] sm:$0xff] (!%p875_p11), %v705_v5  ;;  %729 = vst [vmem:[%s1269_s2 + $0x60] sm:$0xff] (!%p875_p11), %v713_v13 }
 0x143   : > { %688 = vst [vmem:[#allocation2 + $0x38] sm:$0xff] %v672_v63  ;;  %696 = vst [vmem:[#allocation2 + $0x78] sm:$0xff] %v680_v0  ;;  %v714_v14 = vld [vmem:[#allocation2 + $0x68] sm:$0xff] (!%p875_p11) }
 0x144   : > { %722 = vst [vmem:[%s1269_s2 + $0x28] sm:$0xff] %v706_v6  ;;  %730 = vst [vmem:[%s1269_s2 + $0x68] sm:$0xff] %v714_v14 }
 0x148   : > { %v707_v7 = vld [vmem:[#allocation2 + $0x30] sm:$0xff] }
 0x149   : > { %723 = vst [vmem:[%s1269_s2 + $0x30] sm:$0xff] %v707_v7  ;;  %v715_v15 = vld [vmem:[#allocation2 + $0x70] sm:$0xff] }
 0x14a   : > { %v708_v8 = vld [vmem:[#allocation2 + $0x38] sm:$0xff]  ;;  %731 = vst [vmem:[%s1269_s2 + $0x70] sm:$0xff] %v715_v15 }
 0x14b   : > { %724 = vst [vmem:[%s1269_s2 + $0x38] sm:$0xff] %v708_v8  ;;  %v716_v16 = vld [vmem:[#allocation2 + $0x78] sm:$0xff] }
 0x14c   : > { %732 = vst [vmem:[%s1269_s2 + $0x78] sm:$0xff] %v716_v16 }
 0x14d PF: > { %s12_s13 = sadd.s32 1, %s1080_s13   ;;  %s1270_s9 = smov %s1068_s10 }
 0x14e   : > { %p9_p12 = scmp.ge.s32.totalorder %s12_s13, 7   ;;  %s1271_s10 = smov %s1133_s17 }
 0x14f   : > { %s1272_s11 = smov %s1076_s12  ;;  %s1273_s12 = smov %s1275_s14 }
 0x150   :  { %11 = sbr.rel (!%p9_p12) target bundleno = 3 (0x3), region = 112 }

</bundles_post_ra>
